<compile_context>
chip_gen: v7x
topology: tpu7x:2x2x1
jax: 0.10.0
libtpu: 0.0.40
codegen_flags: <defaults>
</compile_context>

<pallas_src>
import functools

import jax
import jax.numpy as jnp
from jax import lax
from jax.experimental import pallas as pl
from jax.experimental.pallas import tpu as pltpu

BN_EPS = 1e-5


def _fused_kernel(x_ref, w_ref, gb_ref, scale_ref, o_ref, *, chunk):
    B, N = o_ref.shape
    n_chunks = B // chunk

    # 1) GEMM on the MXU (f32 accumulation).  The Linear bias is omitted on
    #    purpose: training-mode BatchNorm subtracts the batch mean right after,
    #    so a per-feature constant bias cancels exactly (mean shifts by the
    #    bias, variance unchanged).  y is staged in o_ref and overwritten in
    #    place by the chunked epilogue below.
    o_ref[...] = jnp.dot(x_ref[...], w_ref[...],
                         preferred_element_type=jnp.float32)

    # 2) BatchNorm batch statistics, pushed through the MXU instead of
    #    XLU/VALU cross-sublane reductions, chunked over rows to bound the
    #    vreg live set.
    ones_c = jnp.full((1, chunk), 1.0, jnp.float32)      # hoisted (no re-broadcast)

    def stats_body(c, carry):
        s, ss = carry
        r0 = pl.multiple_of(c * chunk, chunk)
        yc = o_ref[pl.ds(r0, chunk), :]                   # (chunk, N)
        s = s + jnp.dot(ones_c, yc, preferred_element_type=jnp.float32)
        ss = ss + jnp.dot(ones_c, yc * yc, preferred_element_type=jnp.float32)
        return s, ss

    zero_n = jnp.zeros((1, N), jnp.float32)
    s, ss = lax.fori_loop(0, n_chunks, stats_body, (zero_n, zero_n), unroll=True)

    inv_b = jnp.float32(1.0 / B)
    mean = s * inv_b                                      # (1, N)
    # E[y^2] - mean^2: biased (divide-by-B) variance, matching PyTorch's
    # training-mode normalization.  |mean| << std after a Linear layer, so the
    # one-pass form is well within the 1e-5 tolerance here.
    var = ss * inv_b - mean * mean                        # (1, N)

    # 3) Fold gamma, beta, the scalar scale and the mean into one (1,N)
    #    multiply-add:  z = y * a + b
    #        a = rsqrt(var+eps) * gamma * scale
    #        b = beta * scale - mean * a
    sc = scale_ref[0]                                     # scalar from SMEM
    gamma = gb_ref[0:1, :]                                # (1, N)
    beta = gb_ref[1:2, :]                                 # (1, N)
    a = lax.rsqrt(var + BN_EPS) * (gamma * sc)
    b = beta * sc - mean * a

    # 4) Softmax over features (dim=1), per row chunk.  Row-sum goes through
    #    the MXU ((chunk,N) @ (N,1)); only the row-max uses the XLU.
    ones_n = jnp.ones((N, 1), jnp.float32)                # hoisted

    def epi_body(c, carry):
        r0 = pl.multiple_of(c * chunk, chunk)
        rows = pl.ds(r0, chunk)
        z = o_ref[rows, :] * a + b                        # (chunk, N)
        m = jnp.max(z, axis=1, keepdims=True)             # (chunk, 1) XLU
        e = jnp.exp(z - m)                                # EUP
        denom = jnp.dot(e, ones_n, preferred_element_type=jnp.float32)  # MXU
        r = pl.reciprocal(denom, approx=True)             # EUP vrcp (cheap)
        r = r * (2.0 - denom * r)                         # one Newton step -> f32 acc.
        o_ref[rows, :] = e * r
        return carry

    lax.fori_loop(0, n_chunks, epi_body, 0, unroll=True)


def gemm_bn_scale_softmax(x, w_t, gamma, beta, scale, *, chunk=None):
    """
    x:     (B, K) float32
    w_t:   (K, N) float32   -- PyTorch Linear weight (N, K) transposed
    gamma: (N,)   float32   -- BN weight
    beta:  (N,)   float32   -- BN bias
    scale: ()/(1,) float32  -- scalar scale parameter
    returns (B, N) float32

    NOTE: the Linear bias is intentionally not an input: BatchNorm's
    batch-mean subtraction cancels it exactly in training mode.
    """
    B, K = x.shape
    Kw, N = w_t.shape
    assert Kw == K

    if chunk is None:
        chunk = next((c for c in (16, 8) if B % c == 0), B)

    # gamma/beta merged into one (2, N) VMEM input -> one small DMA, not two.
    gb = jnp.stack(
        [gamma.reshape(N).astype(jnp.float32), beta.reshape(N).astype(jnp.float32)],
        axis=0,
    )
    scale1 = jnp.asarray(scale, jnp.float32).reshape((1,))

    vmem = pl.BlockSpec(memory_space=pltpu.MemorySpace.VMEM)
    smem = pl.BlockSpec(memory_space=pltpu.MemorySpace.SMEM)

    cost = pl.CostEstimate(
        flops=2 * B * K * N        # GEMM
        + 2 * 2 * B * N            # MXU stats sums
        + 2 * B * N                # MXU softmax denominator
        + 8 * B * N,               # epilogue VPU work
        transcendentals=B * N + B + N,
        bytes_accessed=4 * (B * K + K * N + 2 * N + 1 + B * N),
    )

    kernel = functools.partial(_fused_kernel, chunk=chunk)

    # TODO(synk): K-tiled grid + two-pass BN + "parallel" batch axis for large
    #             shapes (v7x: 2 TCs, 64 MiB VMEM); gridless is right here.
    return pl.pallas_call(
        kernel,
        out_shape=jax.ShapeDtypeStruct((B, N), jnp.float32),
        in_specs=[vmem, vmem, vmem, smem],
        out_specs=vmem,
        cost_estimate=cost,
    )(x.astype(jnp.float32), w_t.astype(jnp.float32), gb, scale1)


def _reference(x, w_t, bias, gamma, beta, scale):
    # Full reference *including* the Linear bias, to also verify the
    # bias-cancellation argument numerically.
    y = x @ w_t + bias
    mean = y.mean(axis=0, keepdims=True)
    var = ((y - mean) ** 2).mean(axis=0, keepdims=True)
    z = (y - mean) / jnp.sqrt(var + BN_EPS) * gamma + beta
    z = scale * z
    return jax.nn.softmax(z, axis=1)


if __name__ == "__main__":
    # Small shapes consistent with the module: (batch, in_features) ->
    # (batch, out_features).  out_features kept at 512 (matches module),
    # in_features / batch scaled down.
    B, K, N = 64, 256, 512

    key = jax.random.PRNGKey(0)
    kx, kw, kb, kg, kbt = jax.random.split(key, 5)

    x = jax.random.normal(kx, (B, K), dtype=jnp.float32)

    # Linear-style uniform init; BN gamma/beta and scale made non-trivial to
    # exercise the folded affine path.
    bound = 1.0 / (K ** 0.5)
    w = jax.random.uniform(kw, (N, K), minval=-bound, maxval=bound, dtype=jnp.float32)
    bias = jax.random.uniform(kb, (N,), minval=-bound, maxval=bound, dtype=jnp.float32)
    gamma = jax.random.uniform(kg, (N,), minval=0.5, maxval=1.5, dtype=jnp.float32)
    beta = 0.1 * jax.random.normal(kbt, (N,), dtype=jnp.float32)
    scale = jnp.asarray(1.7, jnp.float32)

    w_t = w.T  # (K, N)

    out = gemm_bn_scale_softmax(x, w_t, gamma, beta, scale)
    out = jax.block_until_ready(out)

    ref = _reference(x, w_t, bias, gamma, beta, scale)
    assert out.shape == (B, N)
    assert jnp.allclose(out, ref, atol=1e-5, rtol=1e-5), "mismatch vs reference"

    print("KERNEL_OK")
</pallas_src>

<mosaic_0001>
module attributes {stable_mosaic.version = 11 : i64} {
  func.func @_fused_kernel(%arg0: memref<64x256xf32, #tpu.memory_space<vmem>>, %arg1: memref<256x512xf32, #tpu.memory_space<vmem>>, %arg2: memref<2x512xf32, #tpu.memory_space<vmem>>, %arg3: memref<1xf32, #tpu.memory_space<smem>>, %arg4: memref<64x512xf32, #tpu.memory_space<vmem>>) attributes {dimension_semantics = [], scalar_prefetch = 0 : i64, scratch_operands = 0 : i64, tpu.core_type = #tpu.core_type<tc>} {
    %c0 = arith.constant 0 : index
    %c0_0 = arith.constant 0 : index
    %0 = vector.load %arg0[%c0, %c0_0] : memref<64x256xf32, #tpu.memory_space<vmem>>, vector<64x256xf32>
    %c0_1 = arith.constant 0 : index
    %c0_2 = arith.constant 0 : index
    %1 = vector.load %arg1[%c0_1, %c0_2] : memref<256x512xf32, #tpu.memory_space<vmem>>, vector<256x512xf32>
    %cst = arith.constant dense<0.000000e+00> : vector<64x512xf32>
    %2 = tpu.matmul %0, %1, %cst {dimension_numbers = #tpu.dot_dimension_numbers<[1], [0], [0], [1], [0, 0, 1, 1], [], []>} : vector<64x256xf32>, vector<256x512xf32>, vector<64x512xf32> -> vector<64x512xf32>
    %c0_3 = arith.constant 0 : index
    %c0_4 = arith.constant 0 : index
    %3 = vector.load %arg4[%c0_3, %c0_4] : memref<64x512xf32, #tpu.memory_space<vmem>>, vector<64x512xf32>
    tpu.vector_store %arg4[%c0_3, %c0_4], %2 {strides = array<i32>} : memref<64x512xf32, #tpu.memory_space<vmem>>, vector<64x512xf32>,
    %cst_5 = arith.constant 1.000000e+00 : f32
    %4 = vector.broadcast %cst_5 : f32 to vector<1x16xf32>
    %cst_6 = arith.constant 0.000000e+00 : f32
    %5 = vector.broadcast %cst_6 : f32 to vector<1x512xf32>
    %c0_i32 = arith.constant 0 : i32
    %c16_i32 = arith.constant 16 : i32
    %6 = arith.muli %c0_i32, %c16_i32 : i32
    %7 = tpu.assume_multiple %6, 16 : i32
    %8 = arith.index_cast %7 : i32 to index
    %c0_7 = arith.constant 0 : index
    %9 = vector.load %arg4[%8, %c0_7] : memref<64x512xf32, #tpu.memory_space<vmem>>, vector<16x512xf32>
    %cst_8 = arith.constant dense<0.000000e+00> : vector<1x512xf32>
    %10 = tpu.matmul %4, %9, %cst_8 {dimension_numbers = #tpu.dot_dimension_numbers<[1], [0], [0], [1], [0, 0, 1, 1], [], []>} : vector<1x16xf32>, vector<16x512xf32>, vector<1x512xf32> -> vector<1x512xf32>
    %11 = arith.addf %5, %10 : vector<1x512xf32>
    %12 = arith.mulf %9, %9 : vector<16x512xf32>
    %cst_9 = arith.constant dense<0.000000e+00> : vector<1x512xf32>
    %13 = tpu.matmul %4, %12, %cst_9 {dimension_numbers = #tpu.dot_dimension_numbers<[1], [0], [0], [1], [0, 0, 1, 1], [], []>} : vector<1x16xf32>, vector<16x512xf32>, vector<1x512xf32> -> vector<1x512xf32>
    %14 = arith.addf %5, %13 : vector<1x512xf32>
    %c1_i32 = arith.constant 1 : i32
    %c16_i32_10 = arith.constant 16 : i32
    %15 = arith.muli %c1_i32, %c16_i32_10 : i32
    %16 = tpu.assume_multiple %15, 16 : i32
    %17 = arith.index_cast %16 : i32 to index
    %c0_11 = arith.constant 0 : index
    %18 = vector.load %arg4[%17, %c0_11] : memref<64x512xf32, #tpu.memory_space<vmem>>, vector<16x512xf32>
    %cst_12 = arith.constant dense<0.000000e+00> : vector<1x512xf32>
    %19 = tpu.matmul %4, %18, %cst_12 {dimension_numbers = #tpu.dot_dimension_numbers<[1], [0], [0], [1], [0, 0, 1, 1], [], []>} : vector<1x16xf32>, vector<16x512xf32>, vector<1x512xf32> -> vector<1x512xf32>
    %20 = arith.addf %11, %19 : vector<1x512xf32>
    %21 = arith.mulf %18, %18 : vector<16x512xf32>
    %cst_13 = arith.constant dense<0.000000e+00> : vector<1x512xf32>
    %22 = tpu.matmul %4, %21, %cst_13 {dimension_numbers = #tpu.dot_dimension_numbers<[1], [0], [0], [1], [0, 0, 1, 1], [], []>} : vector<1x16xf32>, vector<16x512xf32>, vector<1x512xf32> -> vector<1x512xf32>
    %23 = arith.addf %14, %22 : vector<1x512xf32>
    %c2_i32 = arith.constant 2 : i32
    %c16_i32_14 = arith.constant 16 : i32
    %24 = arith.muli %c2_i32, %c16_i32_14 : i32
    %25 = tpu.assume_multiple %24, 16 : i32
    %26 = arith.index_cast %25 : i32 to index
    %c0_15 = arith.constant 0 : index
    %27 = vector.load %arg4[%26, %c0_15] : memref<64x512xf32, #tpu.memory_space<vmem>>, vector<16x512xf32>
    %cst_16 = arith.constant dense<0.000000e+00> : vector<1x512xf32>
    %28 = tpu.matmul %4, %27, %cst_16 {dimension_numbers = #tpu.dot_dimension_numbers<[1], [0], [0], [1], [0, 0, 1, 1], [], []>} : vector<1x16xf32>, vector<16x512xf32>, vector<1x512xf32> -> vector<1x512xf32>
    %29 = arith.addf %20, %28 : vector<1x512xf32>
    %30 = arith.mulf %27, %27 : vector<16x512xf32>
    %cst_17 = arith.constant dense<0.000000e+00> : vector<1x512xf32>
    %31 = tpu.matmul %4, %30, %cst_17 {dimension_numbers = #tpu.dot_dimension_numbers<[1], [0], [0], [1], [0, 0, 1, 1], [], []>} : vector<1x16xf32>, vector<16x512xf32>, vector<1x512xf32> -> vector<1x512xf32>
    %32 = arith.addf %23, %31 : vector<1x512xf32>
    %c3_i32 = arith.constant 3 : i32
    %c16_i32_18 = arith.constant 16 : i32
    %33 = arith.muli %c3_i32, %c16_i32_18 : i32
    %34 = tpu.assume_multiple %33, 16 : i32
    %35 = arith.index_cast %34 : i32 to index
    %c0_19 = arith.constant 0 : index
    %36 = vector.load %arg4[%35, %c0_19] : memref<64x512xf32, #tpu.memory_space<vmem>>, vector<16x512xf32>
    %cst_20 = arith.constant dense<0.000000e+00> : vector<1x512xf32>
    %37 = tpu.matmul %4, %36, %cst_20 {dimension_numbers = #tpu.dot_dimension_numbers<[1], [0], [0], [1], [0, 0, 1, 1], [], []>} : vector<1x16xf32>, vector<16x512xf32>, vector<1x512xf32> -> vector<1x512xf32>
    %38 = arith.addf %29, %37 : vector<1x512xf32>
    %39 = arith.mulf %36, %36 : vector<16x512xf32>
    %cst_21 = arith.constant dense<0.000000e+00> : vector<1x512xf32>
    %40 = tpu.matmul %4, %39, %cst_21 {dimension_numbers = #tpu.dot_dimension_numbers<[1], [0], [0], [1], [0, 0, 1, 1], [], []>} : vector<1x16xf32>, vector<16x512xf32>, vector<1x512xf32> -> vector<1x512xf32>
    %41 = arith.addf %32, %40 : vector<1x512xf32>
    %c4_i32 = arith.constant 4 : i32
    %cst_22 = arith.constant 1.562500e-02 : f32
    %42 = vector.broadcast %cst_22 : f32 to vector<1x512xf32>
    %43 = arith.mulf %38, %42 : vector<1x512xf32>
    %cst_23 = arith.constant 1.562500e-02 : f32
    %44 = vector.broadcast %cst_23 : f32 to vector<1x512xf32>
    %45 = arith.mulf %41, %44 : vector<1x512xf32>
    %46 = arith.mulf %43, %43 : vector<1x512xf32>
    %47 = arith.subf %45, %46 : vector<1x512xf32>
    %c0_24 = arith.constant 0 : index
    %48 = memref.load %arg3[%c0_24] : memref<1xf32, #tpu.memory_space<smem>>
    %c0_25 = arith.constant 0 : index
    %c0_26 = arith.constant 0 : index
    %49 = vector.load %arg2[%c0_25, %c0_26] : memref<2x512xf32, #tpu.memory_space<vmem>>, vector<1x512xf32>
    %c1 = arith.constant 1 : index
    %c0_27 = arith.constant 0 : index
    %50 = vector.load %arg2[%c1, %c0_27] : memref<2x512xf32, #tpu.memory_space<vmem>>, vector<1x512xf32>
    %cst_28 = arith.constant 9.99999974E-6 : f32
    %51 = vector.broadcast %cst_28 : f32 to vector<1x512xf32>
    %52 = arith.addf %47, %51 : vector<1x512xf32>
    %53 = math.rsqrt %52 : vector<1x512xf32>
    %54 = vector.broadcast %48 : f32 to vector<1x512xf32>
    %55 = arith.mulf %49, %54 : vector<1x512xf32>
    %56 = arith.mulf %53, %55 : vector<1x512xf32>
    %57 = vector.broadcast %48 : f32 to vector<1x512xf32>
    %58 = arith.mulf %50, %57 : vector<1x512xf32>
    %59 = arith.mulf %43, %56 : vector<1x512xf32>
    %60 = arith.subf %58, %59 : vector<1x512xf32>
    %cst_29 = arith.constant 1.000000e+00 : f32
    %61 = vector.broadcast %cst_29 : f32 to vector<512x1xf32>
    %c0_i32_30 = arith.constant 0 : i32
    %c16_i32_31 = arith.constant 16 : i32
    %62 = arith.muli %c0_i32_30, %c16_i32_31 : i32
    %63 = tpu.assume_multiple %62, 16 : i32
    %64 = arith.index_cast %63 : i32 to index
    %c0_32 = arith.constant 0 : index
    %65 = vector.load %arg4[%64, %c0_32] : memref<64x512xf32, #tpu.memory_space<vmem>>, vector<16x512xf32>
    %66 = vector.broadcast %56 : vector<1x512xf32> to vector<16x512xf32>
    %67 = arith.mulf %65, %66 : vector<16x512xf32>
    %68 = vector.broadcast %60 : vector<1x512xf32> to vector<16x512xf32>
    %69 = arith.addf %67, %68 : vector<16x512xf32>
    %cst_33 = arith.constant dense<0xFF800000> : vector<16xf32>
    %70 = vector.multi_reduction <maximumf>, %69, %cst_33 [1] : vector<16x512xf32> to vector<16xf32>
    %71 = vector.shape_cast %70 : vector<16xf32> to vector<16x1xf32>
    %72 = vector.broadcast %71 : vector<16x1xf32> to vector<16x512xf32>
    %73 = arith.subf %69, %72 : vector<16x512xf32>
    %74 = math.exp %73 : vector<16x512xf32>
    %cst_34 = arith.constant dense<0.000000e+00> : vector<16x1xf32>
    %75 = tpu.matmul %74, %61, %cst_34 {dimension_numbers = #tpu.dot_dimension_numbers<[1], [0], [0], [1], [0, 0, 1, 1], [], []>} : vector<16x512xf32>, vector<512x1xf32>, vector<16x1xf32> -> vector<16x1xf32>
    %76 = tpu.reciprocal %75 {approx = true} : vector<16x1xf32> -> vector<16x1xf32>
    %77 = arith.mulf %75, %76 : vector<16x1xf32>
    %cst_35 = arith.constant 2.000000e+00 : f32
    %78 = vector.broadcast %cst_35 : f32 to vector<16x1xf32>
    %79 = arith.subf %78, %77 : vector<16x1xf32>
    %80 = arith.mulf %76, %79 : vector<16x1xf32>
    %81 = vector.broadcast %80 : vector<16x1xf32> to vector<16x512xf32>
    %82 = arith.mulf %74, %81 : vector<16x512xf32>
    %83 = arith.index_cast %63 : i32 to index
    %c0_36 = arith.constant 0 : index
    %84 = vector.load %arg4[%83, %c0_36] : memref<64x512xf32, #tpu.memory_space<vmem>>, vector<16x512xf32>
    tpu.vector_store %arg4[%83, %c0_36], %82 {strides = array<i32>} : memref<64x512xf32, #tpu.memory_space<vmem>>, vector<16x512xf32>,
    %c1_i32_37 = arith.constant 1 : i32
    %c16_i32_38 = arith.constant 16 : i32
    %85 = arith.muli %c1_i32_37, %c16_i32_38 : i32
    %86 = tpu.assume_multiple %85, 16 : i32
    %87 = arith.index_cast %86 : i32 to index
    %c0_39 = arith.constant 0 : index
    %88 = vector.load %arg4[%87, %c0_39] : memref<64x512xf32, #tpu.memory_space<vmem>>, vector<16x512xf32>
    %89 = vector.broadcast %56 : vector<1x512xf32> to vector<16x512xf32>
    %90 = arith.mulf %88, %89 : vector<16x512xf32>
    %91 = vector.broadcast %60 : vector<1x512xf32> to vector<16x512xf32>
    %92 = arith.addf %90, %91 : vector<16x512xf32>
    %cst_40 = arith.constant dense<0xFF800000> : vector<16xf32>
    %93 = vector.multi_reduction <maximumf>, %92, %cst_40 [1] : vector<16x512xf32> to vector<16xf32>
    %94 = vector.shape_cast %93 : vector<16xf32> to vector<16x1xf32>
    %95 = vector.broadcast %94 : vector<16x1xf32> to vector<16x512xf32>
    %96 = arith.subf %92, %95 : vector<16x512xf32>
    %97 = math.exp %96 : vector<16x512xf32>
    %cst_41 = arith.constant dense<0.000000e+00> : vector<16x1xf32>
    %98 = tpu.matmul %97, %61, %cst_41 {dimension_numbers = #tpu.dot_dimension_numbers<[1], [0], [0], [1], [0, 0, 1, 1], [], []>} : vector<16x512xf32>, vector<512x1xf32>, vector<16x1xf32> -> vector<16x1xf32>
    %99 = tpu.reciprocal %98 {approx = true} : vector<16x1xf32> -> vector<16x1xf32>
    %100 = arith.mulf %98, %99 : vector<16x1xf32>
    %cst_42 = arith.constant 2.000000e+00 : f32
    %101 = vector.broadcast %cst_42 : f32 to vector<16x1xf32>
    %102 = arith.subf %101, %100 : vector<16x1xf32>
    %103 = arith.mulf %99, %102 : vector<16x1xf32>
    %104 = vector.broadcast %103 : vector<16x1xf32> to vector<16x512xf32>
    %105 = arith.mulf %97, %104 : vector<16x512xf32>
    %106 = arith.index_cast %86 : i32 to index
    %c0_43 = arith.constant 0 : index
    %107 = vector.load %arg4[%106, %c0_43] : memref<64x512xf32, #tpu.memory_space<vmem>>, vector<16x512xf32>
    tpu.vector_store %arg4[%106, %c0_43], %105 {strides = array<i32>} : memref<64x512xf32, #tpu.memory_space<vmem>>, vector<16x512xf32>,
    %c2_i32_44 = arith.constant 2 : i32
    %c16_i32_45 = arith.constant 16 : i32
    %108 = arith.muli %c2_i32_44, %c16_i32_45 : i32
    %109 = tpu.assume_multiple %108, 16 : i32
    %110 = arith.index_cast %109 : i32 to index
    %c0_46 = arith.constant 0 : index
    %111 = vector.load %arg4[%110, %c0_46] : memref<64x512xf32, #tpu.memory_space<vmem>>, vector<16x512xf32>
    %112 = vector.broadcast %56 : vector<1x512xf32> to vector<16x512xf32>
    %113 = arith.mulf %111, %112 : vector<16x512xf32>
    %114 = vector.broadcast %60 : vector<1x512xf32> to vector<16x512xf32>
    %115 = arith.addf %113, %114 : vector<16x512xf32>
    %cst_47 = arith.constant dense<0xFF800000> : vector<16xf32>
    %116 = vector.multi_reduction <maximumf>, %115, %cst_47 [1] : vector<16x512xf32> to vector<16xf32>
    %117 = vector.shape_cast %116 : vector<16xf32> to vector<16x1xf32>
    %118 = vector.broadcast %117 : vector<16x1xf32> to vector<16x512xf32>
    %119 = arith.subf %115, %118 : vector<16x512xf32>
    %120 = math.exp %119 : vector<16x512xf32>
    %cst_48 = arith.constant dense<0.000000e+00> : vector<16x1xf32>
    %121 = tpu.matmul %120, %61, %cst_48 {dimension_numbers = #tpu.dot_dimension_numbers<[1], [0], [0], [1], [0, 0, 1, 1], [], []>} : vector<16x512xf32>, vector<512x1xf32>, vector<16x1xf32> -> vector<16x1xf32>
    %122 = tpu.reciprocal %121 {approx = true} : vector<16x1xf32> -> vector<16x1xf32>
    %123 = arith.mulf %121, %122 : vector<16x1xf32>
    %cst_49 = arith.constant 2.000000e+00 : f32
    %124 = vector.broadcast %cst_49 : f32 to vector<16x1xf32>
    %125 = arith.subf %124, %123 : vector<16x1xf32>
    %126 = arith.mulf %122, %125 : vector<16x1xf32>
    %127 = vector.broadcast %126 : vector<16x1xf32> to vector<16x512xf32>
    %128 = arith.mulf %120, %127 : vector<16x512xf32>
    %129 = arith.index_cast %109 : i32 to index
    %c0_50 = arith.constant 0 : index
    %130 = vector.load %arg4[%129, %c0_50] : memref<64x512xf32, #tpu.memory_space<vmem>>, vector<16x512xf32>
    tpu.vector_store %arg4[%129, %c0_50], %128 {strides = array<i32>} : memref<64x512xf32, #tpu.memory_space<vmem>>, vector<16x512xf32>,
    %c3_i32_51 = arith.constant 3 : i32
    %c16_i32_52 = arith.constant 16 : i32
    %131 = arith.muli %c3_i32_51, %c16_i32_52 : i32
    %132 = tpu.assume_multiple %131, 16 : i32
    %133 = arith.index_cast %132 : i32 to index
    %c0_53 = arith.constant 0 : index
    %134 = vector.load %arg4[%133, %c0_53] : memref<64x512xf32, #tpu.memory_space<vmem>>, vector<16x512xf32>
    %135 = vector.broadcast %56 : vector<1x512xf32> to vector<16x512xf32>
    %136 = arith.mulf %134, %135 : vector<16x512xf32>
    %137 = vector.broadcast %60 : vector<1x512xf32> to vector<16x512xf32>
    %138 = arith.addf %136, %137 : vector<16x512xf32>
    %cst_54 = arith.constant dense<0xFF800000> : vector<16xf32>
    %139 = vector.multi_reduction <maximumf>, %138, %cst_54 [1] : vector<16x512xf32> to vector<16xf32>
    %140 = vector.shape_cast %139 : vector<16xf32> to vector<16x1xf32>
    %141 = vector.broadcast %140 : vector<16x1xf32> to vector<16x512xf32>
    %142 = arith.subf %138, %141 : vector<16x512xf32>
    %143 = math.exp %142 : vector<16x512xf32>
    %cst_55 = arith.constant dense<0.000000e+00> : vector<16x1xf32>
    %144 = tpu.matmul %143, %61, %cst_55 {dimension_numbers = #tpu.dot_dimension_numbers<[1], [0], [0], [1], [0, 0, 1, 1], [], []>} : vector<16x512xf32>, vector<512x1xf32>, vector<16x1xf32> -> vector<16x1xf32>
    %145 = tpu.reciprocal %144 {approx = true} : vector<16x1xf32> -> vector<16x1xf32>
    %146 = arith.mulf %144, %145 : vector<16x1xf32>
    %cst_56 = arith.constant 2.000000e+00 : f32
    %147 = vector.broadcast %cst_56 : f32 to vector<16x1xf32>
    %148 = arith.subf %147, %146 : vector<16x1xf32>
    %149 = arith.mulf %145, %148 : vector<16x1xf32>
    %150 = vector.broadcast %149 : vector<16x1xf32> to vector<16x512xf32>
    %151 = arith.mulf %143, %150 : vector<16x512xf32>
    %152 = arith.index_cast %132 : i32 to index
    %c0_57 = arith.constant 0 : index
    %153 = vector.load %arg4[%152, %c0_57] : memref<64x512xf32, #tpu.memory_space<vmem>>, vector<16x512xf32>
    tpu.vector_store %arg4[%152, %c0_57], %151 {strides = array<i32>} : memref<64x512xf32, #tpu.memory_space<vmem>>, vector<16x512xf32>,
    %c4_i32_58 = arith.constant 4 : i32
    return
  }
}

</mosaic_0001>

<bundles_post_ra>
// kernel: tpu_custom_call.1
= control target key start
LH: loop header
LB: loop body
LE: loop exit
PB: predicated region body
PF: predicated region fallthrough
CT: control target
= control target key end

     0   :  { %10 = vsyncpa [#allocation4], 0  ;;  %s4448_s0 = inlined_call_operand.hbm [shape: f32[64,256], index: 0, kind: input, shape index: {}]   ;;  %s4449_s1 = inlined_call_operand.hbm [shape: f32[256,512], index: 1, kind: input, shape index: {}]   ;;  %s4450_s2 = inlined_call_operand.vmem [shape: f32[2,512], index: 2, kind: input, shape index: {}]   ;;  %s4451_s3 = inlined_call_operand.<no memory space> [shape: f32[1], index: 3, kind: input, shape index: {}]   ;;  %s4452_s4 = inlined_call_operand.hbm [shape: f32[64,512], index: 4, kind: output, shape index: {}]  }
   0x1   :  { %11 = vsyncpa [#allocation7], 0 }
   0x2   :  { %12 = vsyncpa [#allocation5], 0  ;;  %s3628_s15 = smov [#allocation3]   ;;  %s3556_s19 = scalar_lea.hbm %s4448_s0, 2048 }
   0x3   :  { %s18_s16 = sshll.u32 %s3628_s15, 4  ;;  %p3557_p0 = scmp.ne.s32.totalorder %s4448_s0, %s3556_s19  ;;  %s19_s16 = int_to_ptr.vmem [resolvable:$true] %s18_s16 }
   0x4   :  { %p3560_p1 = scmp.lt.u32.totalorder %s3556_s19, %s4448_s0 }
   0x6   :  { %p3562_p2 = pnand %p3560_p1, %p3557_p0 }
   0x8   :  { %3565 = shalt.err (!%p3562_p2)
}
   0x9   :  { %s3566_s24 = scalar_lea.vmem %s19_s16, 2048  ;;  %p3571_p4 = scmp.lt.s32.totalorder %s19_s16, %s19_s16 }
   0xa   :  { %p3567_p3 = scmp.ne.s32.totalorder %s19_s16, %s3566_s24  ;;  %p3572_p5 = scmp.lt.s32.totalorder %s3566_s24, %s3566_s24 }
   0xc   :  { %p3573_p6 = por %p3572_p5, %p3571_p4 }
   0xe   :  { %p3574_p7 = pnand %p3573_p6, %p3567_p3 }
  0x10   :  { %3577 = shalt.err (!%p3574_p7)
}
  0x11   :  { %s3629_s25 = smov 256   ;;  %s3630_s26 = smov 16  }
  0x12   :  { %24 = dma.hbm_to_vmem [thread:$0]  %s4448_s0, 2048, %s19_s16, [#allocation4], %s3629_s25, %s3629_s25, %s3630_s26  }
  0x13   :  { %s3631_s29 = smov [#allocation6]   ;;  %s3578_s7 = scalar_lea.hbm %s4449_s1, 16384 }
  0x14   :  { %s30_s30 = sshll.u32 %s3631_s29, 4  ;;  %p3579_p8 = scmp.ne.s32.totalorder %s4449_s1, %s3578_s7  ;;  %s31_s30 = int_to_ptr.vmem [resolvable:$true] %s30_s30 }
  0x15   :  { %p3582_p9 = scmp.lt.u32.totalorder %s3578_s7, %s4449_s1 }
  0x17   :  { %p3584_p10 = pnand %p3582_p9, %p3579_p8 }
  0x19   :  { %3587 = shalt.err (!%p3584_p10)
}
  0x1a   :  { %s3588_s12 = scalar_lea.vmem %s31_s30, 16384  ;;  %p3593_p12 = scmp.lt.s32.totalorder %s31_s30, %s31_s30 }
  0x1b   :  { %p3589_p11 = scmp.ne.s32.totalorder %s31_s30, %s3588_s12  ;;  %p3594_p13 = scmp.lt.s32.totalorder %s3588_s12, %s3588_s12 }
  0x1d   :  { %p3595_p0 = por %p3594_p13, %p3593_p12 }
  0x1f   :  { %p3596_p1 = pnand %p3595_p0, %p3589_p11 }
  0x21   :  { %3599 = shalt.err (!%p3596_p1)
}
  0x22   :  { %s3632_s0 = smov 512   ;;  %s3633_s13 = smov 32  }
  0x23   :  { %36 = dma.hbm_to_vmem [thread:$0]  %s4449_s1, 16384, %s31_s30, [#allocation7], %s3632_s0, %s3632_s0, %s3633_s13  }
  0x24   :  { %3622 = dma.done.wait [#allocation4], 2048  }
  0x25   :  { %3623 = vsyncadd [#allocation4], 4294965248 }
  0x26   :  { %3624 = dma.done.wait [#allocation7], 16384  }
  0x27   :  { %3625 = vsyncadd [#allocation7], 4294950912  ;;  %v64_v0 = vld [vmem:[#allocation6 + $0x8] sm:$0xff]  ;;  %v66_v2 = vld [vmem:[#allocation6 + $0x18] sm:$0xff]  ;;  %vm479_vm0 = vcmask 130048  }
  0x28   :  { %v68_v1 = vld [vmem:[#allocation6 + $0x28] sm:$0xff]  ;;  %v70_v4 = vld [vmem:[#allocation6 + $0x38] sm:$0xff]  ;;  %v63_v5 = vld [vmem:[#allocation6] sm:$0xff] }
  0x29   :  { %v3110_v3 = vpack.c.bf16 %v68_v1, %v64_v0  ;;  %v67_v6 = vld [vmem:[#allocation6 + $0x20] sm:$0xff]  ;;  %v3174_v7 = vpack.c.bf16 %v70_v4, %v66_v2  ;;  %v65_v9 = vld [vmem:[#allocation6 + $0x10] sm:$0xff]  ;;  %v72_v11 = vld [vmem:[#allocation6 + $0x48] sm:$0xff] }
  0x2a   :  { %v3112_v8 = vpack.c.bf16 %v67_v6, %v63_v5  ;;  %v69_v10 = vld [vmem:[#allocation6 + $0x30] sm:$0xff]  ;;  %v76_v13 = vld [vmem:[#allocation6 + $0x68] sm:$0xff]  ;;  %v74_v14 = vld [vmem:[#allocation6 + $0x58] sm:$0xff] }
  0x2b   :  { %3111 = vmatprep.subr.bf16.mxu0 %v3110_v3  ;;  %v3176_v12 = vpack.c.bf16 %v69_v10, %v65_v9  ;;  %v78_v15 = vld [vmem:[#allocation6 + $0x78] sm:$0xff]  ;;  %3175 = vmatprep.subr.bf16.mxu1 %v3174_v7  ;;  %v3114_v16 = vpack.c.bf16 %v76_v13, %v72_v11  ;;  %v71_v18 = vld [vmem:[#allocation6 + $0x40] sm:$0xff]  ;;  %v73_v20 = vld [vmem:[#allocation6 + $0x50] sm:$0xff] }
  0x2c   :  { %3113 = vmatpush1.bf16.msra.mxu0 %v3112_v8  ;;  %v3178_v17 = vpack.c.bf16 %v78_v15, %v74_v14  ;;  %v75_v19 = vld [vmem:[#allocation6 + $0x60] sm:$0xff]  ;;  %v77_v22 = vld [vmem:[#allocation6 + $0x70] sm:$0xff]  ;;  %v80_v23 = vld [vmem:[#allocation6 + $0x88] sm:$0xff] }
  0x2d   :  { %3177 = vmatpush1.bf16.msra.mxu1 %v3176_v12  ;;  %v3116_v21 = vpack.c.bf16 %v75_v19, %v71_v18  ;;  %v84_v24 = vld [vmem:[#allocation6 + $0xa8] sm:$0xff]  ;;  %3115 = vmatprep.subr.bf16.mxu0 %v3114_v16  ;;  %v3180_v25 = vpack.c.bf16 %v77_v22, %v73_v20  ;;  %v82_v27 = vld [vmem:[#allocation6 + $0x98] sm:$0xff]  ;;  %v79_v29 = vld [vmem:[#allocation6 + $0x80] sm:$0xff] }
  0x2e   :  { %3179 = vmatprep.subr.bf16.mxu1 %v3178_v17  ;;  %v3118_v26 = vpack.c.bf16 %v84_v24, %v80_v23  ;;  %v86_v28 = vld [vmem:[#allocation6 + $0xb8] sm:$0xff]  ;;  %v83_v31 = vld [vmem:[#allocation6 + $0xa0] sm:$0xff]  ;;  %v81_v32 = vld [vmem:[#allocation6 + $0x90] sm:$0xff] }
  0x2f   :  { %v3182_v30 = vpack.c.bf16 %v86_v28, %v82_v27  ;;  %v85_v33 = vld [vmem:[#allocation6 + $0xb0] sm:$0xff]  ;;  %v3120_v34 = vpack.c.bf16 %v83_v31, %v79_v29  ;;  %v88_v35 = vld [vmem:[#allocation6 + $0xc8] sm:$0xff]  ;;  %v90_v37 = vld [vmem:[#allocation6 + $0xd8] sm:$0xff] }
  0x30   :  { %3117 = vmatpush1.bf16.msra.mxu0 %v3116_v21  ;;  %v92_v36 = vld [vmem:[#allocation6 + $0xe8] sm:$0xff]  ;;  %v3184_v38 = vpack.c.bf16 %v85_v33, %v81_v32  ;;  %v94_v40 = vld [vmem:[#allocation6 + $0xf8] sm:$0xff]  ;;  %v87_v41 = vld [vmem:[#allocation6 + $0xc0] sm:$0xff] }
  0x31   :  { %3181 = vmatpush1.bf16.msra.mxu1 %v3180_v25  ;;  %3119 = vmatprep.subr.bf16.mxu0 %v3118_v26  ;;  %v3122_v39 = vpack.c.bf16 %v92_v36, %v88_v35  ;;  %v91_v42 = vld [vmem:[#allocation6 + $0xe0] sm:$0xff]  ;;  %v3186_v43 = vpack.c.bf16 %v94_v40, %v90_v37  ;;  %v89_v44 = vld [vmem:[#allocation6 + $0xd0] sm:$0xff]  ;;  %v96_v46 = vld [vmem:[#allocation6 + $0x108] sm:$0xff] }
  0x32   :  { %3183 = vmatprep.subr.bf16.mxu1 %v3182_v30  ;;  %v93_v45 = vld [vmem:[#allocation6 + $0xf0] sm:$0xff]  ;;  %v100_v47 = vld [vmem:[#allocation6 + $0x128] sm:$0xff]  ;;  %v98_v48 = vld [vmem:[#allocation6 + $0x118] sm:$0xff]  ;;  %v3124_v50 = vpack.c.bf16 %v91_v42, %v87_v41 }
  0x33   :  { %v102_v49 = vld [vmem:[#allocation6 + $0x138] sm:$0xff]  ;;  %v3188_v51 = vpack.c.bf16 %v93_v45, %v89_v44  ;;  %v3126_v52 = vpack.c.bf16 %v100_v47, %v96_v46  ;;  %v95_v53 = vld [vmem:[#allocation6 + $0x100] sm:$0xff]  ;;  %v97_v55 = vld [vmem:[#allocation6 + $0x110] sm:$0xff] }
  0x34   :  { %3121 = vmatpush1.bf16.msra.mxu0 %v3120_v34  ;;  %v99_v54 = vld [vmem:[#allocation6 + $0x120] sm:$0xff]  ;;  %v3190_v56 = vpack.c.bf16 %v102_v49, %v98_v48  ;;  %v101_v57 = vld [vmem:[#allocation6 + $0x130] sm:$0xff]  ;;  %v104_v58 = vld [vmem:[#allocation6 + $0x148] sm:$0xff] }
  0x35   :  { %3185 = vmatpush1.bf16.msra.mxu1 %v3184_v38  ;;  %3123 = vmatprep.subr.bf16.mxu0 %v3122_v39  ;;  %v108_v59 = vld [vmem:[#allocation6 + $0x168] sm:$0xff]  ;;  %v106_v60 = vld [vmem:[#allocation6 + $0x158] sm:$0xff]  ;;  %v3128_v62 = vpack.c.bf16 %v99_v54, %v95_v53  ;;  %v3192_v63 = vpack.c.bf16 %v101_v57, %v97_v55  ;;  %v103_v1 = vld [vmem:[#allocation6 + $0x140] sm:$0xff] }
  0x36   :  { %3187 = vmatprep.subr.bf16.mxu1 %v3186_v43  ;;  %v110_v61 = vld [vmem:[#allocation6 + $0x178] sm:$0xff]  ;;  %v3130_v0 = vpack.c.bf16 %v108_v59, %v104_v58  ;;  %v107_v2 = vld [vmem:[#allocation6 + $0x160] sm:$0xff]  ;;  %v105_v3 = vld [vmem:[#allocation6 + $0x150] sm:$0xff] }
  0x37   :  { %v3194_v4 = vpack.c.bf16 %v110_v61, %v106_v60  ;;  %v109_v5 = vld [vmem:[#allocation6 + $0x170] sm:$0xff]  ;;  %v112_v6 = vld [vmem:[#allocation6 + $0x188] sm:$0xff]  ;;  %v114_v8 = vld [vmem:[#allocation6 + $0x198] sm:$0xff]  ;;  %v3132_v10 = vpack.c.bf16 %v107_v2, %v103_v1 }
  0x38   :  { %3125 = vmatpush1.bf16.msra.mxu0 %v3124_v50  ;;  %v116_v7 = vld [vmem:[#allocation6 + $0x1a8] sm:$0xff]  ;;  %v118_v9 = vld [vmem:[#allocation6 + $0x1b8] sm:$0xff]  ;;  %v3196_v11 = vpack.c.bf16 %v109_v5, %v105_v3  ;;  %v111_v13 = vld [vmem:[#allocation6 + $0x180] sm:$0xff] }
  0x39   :  { %3189 = vmatpush1.bf16.msra.mxu1 %v3188_v51  ;;  %3127 = vmatprep.subr.bf16.mxu0 %v3126_v52  ;;  %v3134_v12 = vpack.c.bf16 %v116_v7, %v112_v6  ;;  %v115_v14 = vld [vmem:[#allocation6 + $0x1a0] sm:$0xff]  ;;  %v113_v15 = vld [vmem:[#allocation6 + $0x190] sm:$0xff]  ;;  %v3198_v16 = vpack.c.bf16 %v118_v9, %v114_v8  ;;  %v120_v18 = vld [vmem:[#allocation6 + $0x1c8] sm:$0xff] }
  0x3a   :  { %3191 = vmatprep.subr.bf16.mxu1 %v3190_v56  ;;  %v117_v17 = vld [vmem:[#allocation6 + $0x1b0] sm:$0xff]  ;;  %v124_v19 = vld [vmem:[#allocation6 + $0x1e8] sm:$0xff]  ;;  %v122_v20 = vld [vmem:[#allocation6 + $0x1d8] sm:$0xff]  ;;  %v3136_v22 = vpack.c.bf16 %v115_v14, %v111_v13 }
  0x3b   :  { %v126_v21 = vld [vmem:[#allocation6 + $0x1f8] sm:$0xff]  ;;  %v3200_v23 = vpack.c.bf16 %v117_v17, %v113_v15  ;;  %v3138_v24 = vpack.c.bf16 %v124_v19, %v120_v18  ;;  %v119_v25 = vld [vmem:[#allocation6 + $0x1c0] sm:$0xff]  ;;  %v121_v27 = vld [vmem:[#allocation6 + $0x1d0] sm:$0xff] }
  0x3c   :  { %3129 = vmatpush1.bf16.msra.mxu0 %v3128_v62  ;;  %v123_v26 = vld [vmem:[#allocation6 + $0x1e0] sm:$0xff]  ;;  %v3202_v28 = vpack.c.bf16 %v126_v21, %v122_v20  ;;  %v125_v29 = vld [vmem:[#allocation6 + $0x1f0] sm:$0xff]  ;;  %v128_v30 = vld [vmem:[#allocation6 + $0x208] sm:$0xff] }
  0x3d   :  { %3193 = vmatpush1.bf16.msra.mxu1 %v3192_v63  ;;  %3131 = vmatprep.subr.bf16.mxu0 %v3130_v0  ;;  %v132_v31 = vld [vmem:[#allocation6 + $0x228] sm:$0xff]  ;;  %v130_v32 = vld [vmem:[#allocation6 + $0x218] sm:$0xff]  ;;  %v3140_v34 = vpack.c.bf16 %v123_v26, %v119_v25  ;;  %v3204_v35 = vpack.c.bf16 %v125_v29, %v121_v27  ;;  %v127_v37 = vld [vmem:[#allocation6 + $0x200] sm:$0xff] }
  0x3e   :  { %3195 = vmatprep.subr.bf16.mxu1 %v3194_v4  ;;  %v134_v33 = vld [vmem:[#allocation6 + $0x238] sm:$0xff]  ;;  %v3142_v36 = vpack.c.bf16 %v132_v31, %v128_v30  ;;  %v131_v38 = vld [vmem:[#allocation6 + $0x220] sm:$0xff]  ;;  %v129_v39 = vld [vmem:[#allocation6 + $0x210] sm:$0xff] }
  0x3f   :  { %v3206_v40 = vpack.c.bf16 %v134_v33, %v130_v32  ;;  %v133_v41 = vld [vmem:[#allocation6 + $0x230] sm:$0xff]  ;;  %v136_v42 = vld [vmem:[#allocation6 + $0x248] sm:$0xff]  ;;  %v138_v44 = vld [vmem:[#allocation6 + $0x258] sm:$0xff]  ;;  %v3144_v46 = vpack.c.bf16 %v131_v38, %v127_v37 }
  0x40   :  { %3133 = vmatpush1.bf16.msra.mxu0 %v3132_v10  ;;  %v140_v43 = vld [vmem:[#allocation6 + $0x268] sm:$0xff]  ;;  %v142_v45 = vld [vmem:[#allocation6 + $0x278] sm:$0xff]  ;;  %v3208_v47 = vpack.c.bf16 %v133_v41, %v129_v39  ;;  %v135_v49 = vld [vmem:[#allocation6 + $0x240] sm:$0xff] }
  0x41   :  { %3197 = vmatpush1.bf16.msra.mxu1 %v3196_v11  ;;  %3135 = vmatprep.subr.bf16.mxu0 %v3134_v12  ;;  %v3146_v48 = vpack.c.bf16 %v140_v43, %v136_v42  ;;  %v139_v50 = vld [vmem:[#allocation6 + $0x260] sm:$0xff]  ;;  %v137_v51 = vld [vmem:[#allocation6 + $0x250] sm:$0xff]  ;;  %v3210_v52 = vpack.c.bf16 %v142_v45, %v138_v44  ;;  %v144_v54 = vld [vmem:[#allocation6 + $0x288] sm:$0xff] }
  0x42   :  { %3199 = vmatprep.subr.bf16.mxu1 %v3198_v16  ;;  %v141_v53 = vld [vmem:[#allocation6 + $0x270] sm:$0xff]  ;;  %v148_v55 = vld [vmem:[#allocation6 + $0x2a8] sm:$0xff]  ;;  %v146_v56 = vld [vmem:[#allocation6 + $0x298] sm:$0xff]  ;;  %v3148_v58 = vpack.c.bf16 %v139_v50, %v135_v49 }
  0x43   :  { %v150_v57 = vld [vmem:[#allocation6 + $0x2b8] sm:$0xff]  ;;  %v3212_v59 = vpack.c.bf16 %v141_v53, %v137_v51  ;;  %v3150_v60 = vpack.c.bf16 %v148_v55, %v144_v54  ;;  %v143_v61 = vld [vmem:[#allocation6 + $0x280] sm:$0xff]  ;;  %v145_v63 = vld [vmem:[#allocation6 + $0x290] sm:$0xff] }
  0x44   :  { %3137 = vmatpush1.bf16.msra.mxu0 %v3136_v22  ;;  %v147_v62 = vld [vmem:[#allocation6 + $0x2a0] sm:$0xff]  ;;  %v3214_v0 = vpack.c.bf16 %v150_v57, %v146_v56  ;;  %v149_v1 = vld [vmem:[#allocation6 + $0x2b0] sm:$0xff]  ;;  %v152_v2 = vld [vmem:[#allocation6 + $0x2c8] sm:$0xff] }
  0x45   :  { %3201 = vmatpush1.bf16.msra.mxu1 %v3200_v23  ;;  %3139 = vmatprep.subr.bf16.mxu0 %v3138_v24  ;;  %v156_v3 = vld [vmem:[#allocation6 + $0x2e8] sm:$0xff]  ;;  %v154_v4 = vld [vmem:[#allocation6 + $0x2d8] sm:$0xff]  ;;  %v3152_v6 = vpack.c.bf16 %v147_v62, %v143_v61  ;;  %v151_v7 = vld [vmem:[#allocation6 + $0x2c0] sm:$0xff]  ;;  %v3216_v8 = vpack.c.bf16 %v149_v1, %v145_v63 }
  0x46   :  { %3203 = vmatprep.subr.bf16.mxu1 %v3202_v28  ;;  %v158_v5 = vld [vmem:[#allocation6 + $0x2f8] sm:$0xff]  ;;  %v3154_v9 = vpack.c.bf16 %v156_v3, %v152_v2  ;;  %v155_v10 = vld [vmem:[#allocation6 + $0x2e0] sm:$0xff]  ;;  %v153_v11 = vld [vmem:[#allocation6 + $0x2d0] sm:$0xff] }
  0x47   :  { %v157_v12 = vld [vmem:[#allocation6 + $0x2f0] sm:$0xff]  ;;  %v3218_v13 = vpack.c.bf16 %v158_v5, %v154_v4  ;;  %v160_v14 = vld [vmem:[#allocation6 + $0x308] sm:$0xff]  ;;  %v162_v17 = vld [vmem:[#allocation6 + $0x318] sm:$0xff]  ;;  %v3156_v19 = vpack.c.bf16 %v155_v10, %v151_v7 }
  0x48   :  { %3141 = vmatpush1.bf16.msra.mxu0 %v3140_v34  ;;  %v164_v15 = vld [vmem:[#allocation6 + $0x328] sm:$0xff]  ;;  %v166_v18 = vld [vmem:[#allocation6 + $0x338] sm:$0xff]  ;;  %v3220_v20 = vpack.c.bf16 %v157_v12, %v153_v11  ;;  %v159_v22 = vld [vmem:[#allocation6 + $0x300] sm:$0xff] }
  0x49   :  { %3205 = vmatpush1.bf16.msra.mxu1 %v3204_v35  ;;  %3143 = vmatprep.subr.bf16.mxu0 %v3142_v36  ;;  %v48_v16 = vld [vmem:[#allocation3 + $0x8] sm:$0xff]  ;;  %v3158_v21 = vpack.c.bf16 %v164_v15, %v160_v14  ;;  %v163_v23 = vld [vmem:[#allocation6 + $0x320] sm:$0xff]  ;;  %v161_v24 = vld [vmem:[#allocation6 + $0x310] sm:$0xff]  ;;  %v3222_v25 = vpack.c.bf16 %v166_v18, %v162_v17 }
  0x4a   :  { %3207 = vmatprep.subr.bf16.mxu1 %v3206_v40  ;;  %255 = vmatprep.mubr.f32.mxu0 %v48_v16  ;;  %v165_v26 = vld [vmem:[#allocation6 + $0x330] sm:$0xff]  ;;  %v168_v27 = vld [vmem:[#allocation6 + $0x348] sm:$0xff]  ;;  %v170_v29 = vld [vmem:[#allocation6 + $0x358] sm:$0xff]  ;;  %v3160_v31 = vpack.c.bf16 %v163_v23, %v159_v22 }
  0x4b   :  { %368 = vmatprep.mubr.f32.mxu1 %v48_v16  ;;  %v172_v28 = vld [vmem:[#allocation6 + $0x368] sm:$0xff]  ;;  %v174_v30 = vld [vmem:[#allocation6 + $0x378] sm:$0xff]  ;;  %v3224_v32 = vpack.c.bf16 %v165_v26, %v161_v24  ;;  %v167_v34 = vld [vmem:[#allocation6 + $0x340] sm:$0xff]  ;;  %v3634_v16 = vmov 0.0  }
  0x4c   :  { %3145 = vmatpush1.bf16.msra.mxu0 %v3144_v46  ;;  %v3162_v33 = vpack.c.bf16 %v172_v28, %v168_v27  ;;  %v171_v35 = vld [vmem:[#allocation6 + $0x360] sm:$0xff]  ;;  %v169_v36 = vld [vmem:[#allocation6 + $0x350] sm:$0xff]  ;;  %v3226_v37 = vpack.c.bf16 %v174_v30, %v170_v29  ;;  %v176_v39 = vld [vmem:[#allocation6 + $0x388] sm:$0xff] }
  0x4d   :  { %3209 = vmatpush1.bf16.msra.mxu1 %v3208_v47  ;;  %3147 = vmatprep.subr.bf16.mxu0 %v3146_v48  ;;  %v173_v38 = vld [vmem:[#allocation6 + $0x370] sm:$0xff]  ;;  %v180_v40 = vld [vmem:[#allocation6 + $0x3a8] sm:$0xff]  ;;  %v178_v41 = vld [vmem:[#allocation6 + $0x398] sm:$0xff]  ;;  %v3164_v43 = vpack.c.bf16 %v171_v35, %v167_v34 }
  0x4e   :  { %3211 = vmatprep.subr.bf16.mxu1 %v3210_v52  ;;  %v182_v42 = vld [vmem:[#allocation6 + $0x3b8] sm:$0xff]  ;;  %v3228_v44 = vpack.c.bf16 %v173_v38, %v169_v36  ;;  %v3166_v45 = vpack.c.bf16 %v180_v40, %v176_v39  ;;  %v175_v46 = vld [vmem:[#allocation6 + $0x380] sm:$0xff]  ;;  %v177_v48 = vld [vmem:[#allocation6 + $0x390] sm:$0xff] }
  0x4f   :  { %v179_v47 = vld [vmem:[#allocation6 + $0x3a0] sm:$0xff]  ;;  %v3230_v49 = vpack.c.bf16 %v182_v42, %v178_v41  ;;  %v181_v50 = vld [vmem:[#allocation6 + $0x3b0] sm:$0xff]  ;;  %v184_v51 = vld [vmem:[#allocation6 + $0x3c8] sm:$0xff] }
  0x50   :  { %3149 = vmatpush1.bf16.msra.mxu0 %v3148_v58  ;;  %v188_v52 = vld [vmem:[#allocation6 + $0x3e8] sm:$0xff]  ;;  %v186_v53 = vld [vmem:[#allocation6 + $0x3d8] sm:$0xff]  ;;  %v3168_v55 = vpack.c.bf16 %v179_v47, %v175_v46  ;;  %v3232_v56 = vpack.c.bf16 %v181_v50, %v177_v48  ;;  %v183_v58 = vld [vmem:[#allocation6 + $0x3c0] sm:$0xff] }
  0x51   :  { %3213 = vmatpush1.bf16.msra.mxu1 %v3212_v59  ;;  %3151 = vmatprep.subr.bf16.mxu0 %v3150_v60  ;;  %v190_v54 = vld [vmem:[#allocation6 + $0x3f8] sm:$0xff]  ;;  %v3170_v57 = vpack.c.bf16 %v188_v52, %v184_v51  ;;  %v187_v59 = vld [vmem:[#allocation6 + $0x3e0] sm:$0xff]  ;;  %v185_v61 = vld [vmem:[#allocation6 + $0x3d0] sm:$0xff] }
  0x52   :  { %3215 = vmatprep.subr.bf16.mxu1 %v3214_v0  ;;  %v3234_v60 = vpack.c.bf16 %v190_v54, %v186_v53  ;;  %v189_v62 = vld [vmem:[#allocation6 + $0x3f0] sm:$0xff]  ;;  %v3172_v63 = vpack.c.bf16 %v187_v59, %v183_v58  ;;  %v47_v1 = vld [vmem:[#allocation3] sm:$0xff]  ;;  %v50_v2 = vld [vmem:[#allocation3 + $0x18] sm:$0xff] }
  0x53   :  { %v3236_v0 = vpack.c.bf16 %v189_v62, %v185_v61  ;;  %v49_v3 = vld [vmem:[#allocation3 + $0x10] sm:$0xff]  ;;  %v52_v4 = vld [vmem:[#allocation3 + $0x28] sm:$0xff]  ;;  %v51_v5 = vld [vmem:[#allocation3 + $0x20] sm:$0xff] }
  0x54   :  { %3153 = vmatpush1.bf16.msra.mxu0 %v3152_v6  ;;  %v54_v6 = vld [vmem:[#allocation3 + $0x38] sm:$0xff]  ;;  %v53_v7 = vld [vmem:[#allocation3 + $0x30] sm:$0xff]  ;;  %v60_v12 = vld [vmem:[#allocation3 + $0x68] sm:$0xff] }
  0x55   :  { %3217 = vmatpush1.bf16.msra.mxu1 %v3216_v8  ;;  %3155 = vmatprep.subr.bf16.mxu0 %v3154_v9  ;;  %v56_v8 = vld [vmem:[#allocation3 + $0x48] sm:$0xff]  ;;  %v55_v9 = vld [vmem:[#allocation3 + $0x40] sm:$0xff]  ;;  %v58_v10 = vld [vmem:[#allocation3 + $0x58] sm:$0xff] }
  0x56   :  { %3219 = vmatprep.subr.bf16.mxu1 %v3218_v13  ;;  %v57_v11 = vld [vmem:[#allocation3 + $0x50] sm:$0xff]  ;;  %v59_v13 = vld [vmem:[#allocation3 + $0x60] sm:$0xff]  ;;  %v62_v14 = vld [vmem:[#allocation3 + $0x78] sm:$0xff] }
  0x57   :  { %v61_v15 = vld [vmem:[#allocation3 + $0x70] sm:$0xff] }
  0x58   :  { %3157 = vmatpush1.bf16.msra.mxu0 %v3156_v19 }
  0x59   :  { %3221 = vmatpush1.bf16.msra.mxu1 %v3220_v20  ;;  %3159 = vmatprep.subr.bf16.mxu0 %v3158_v21 }
  0x5a   :  { %3223 = vmatprep.subr.bf16.mxu1 %v3222_v25 }
  0x5c   :  { %3161 = vmatpush1.bf16.msra.mxu0 %v3160_v31 }
  0x5d   :  { %3225 = vmatpush1.bf16.msra.mxu1 %v3224_v32  ;;  %3163 = vmatprep.subr.bf16.mxu0 %v3162_v33 }
  0x5e   :  { %3227 = vmatprep.subr.bf16.mxu1 %v3226_v37 }
  0x60   :  { %3165 = vmatpush1.bf16.msra.mxu0 %v3164_v43 }
  0x61   :  { %3229 = vmatpush1.bf16.msra.mxu1 %v3228_v44  ;;  %3167 = vmatprep.subr.bf16.mxu0 %v3166_v45 }
  0x62   :  { %3231 = vmatprep.subr.bf16.mxu1 %v3230_v49 }
  0x64   :  { %3169 = vmatpush1.bf16.msra.mxu0 %v3168_v55 }
  0x65   :  { %3233 = vmatpush1.bf16.msra.mxu1 %v3232_v56  ;;  %3171 = vmatprep.subr.bf16.mxu0 %v3170_v57 }
  0x66   :  { %3235 = vmatprep.subr.bf16.mxu1 %v3234_v60 }
  0x68   :  { %3173 = vmatpush1.bf16.msra.mxu0 %v3172_v63 }
  0x69   :  { %3237 = vmatpush1.bf16.msra.mxu1 %v3236_v0 }
  0x6b   :  { %256 = vmatmul.mubr.f32.vlgmr.msra.gmra.mrb[0].mxu0 %v47_v1 }
  0x6c   :  { %369 = vmatmul.mubr.f32.vlgmr.msra.gmra.mrb[0].mxu1 %v47_v1  ;;  %261 = vmatprep.mubr.f32.mxu0 %v50_v2 }
  0x6d   :  { %374 = vmatprep.mubr.f32.mxu1 %v50_v2 }
  0x6f   :  { %262 = vmatmul.mubr.f32.gmra.mrb[2].mxu0 %v49_v3 }
  0x70   :  { %375 = vmatmul.mubr.f32.gmra.mrb[2].mxu1 %v49_v3  ;;  %267 = vmatprep.mubr.f32.mxu0 %v52_v4 }
  0x71   :  { %380 = vmatprep.mubr.f32.mxu1 %v52_v4 }
  0x73   :  { %268 = vmatmul.mubr.f32.gmra.mrb[4].mxu0 %v51_v5 }
  0x74   :  { %381 = vmatmul.mubr.f32.gmra.mrb[4].mxu1 %v51_v5  ;;  %273 = vmatprep.mubr.f32.mxu0 %v54_v6 }
  0x75   :  { %386 = vmatprep.mubr.f32.mxu1 %v54_v6  ;;  %v3635_v6 = vmov 1.0  }
  0x77   :  { %274 = vmatmul.mubr.f32.gmra.mrb[6].mxu0 %v53_v7 }
  0x78   :  { %387 = vmatmul.mubr.f32.gmra.mrb[6].mxu1 %v53_v7  ;;  %279 = vmatprep.mubr.f32.mxu0 %v56_v8 }
  0x79   :  { %392 = vmatprep.mubr.f32.mxu1 %v56_v8 }
  0x7b   :  { %280 = vmatmul.mubr.f32.gmra.mrb[8].mxu0 %v55_v9 }
  0x7c   :  { %393 = vmatmul.mubr.f32.gmra.mrb[8].mxu1 %v55_v9  ;;  %285 = vmatprep.mubr.f32.mxu0 %v58_v10 }
  0x7d   :  { %398 = vmatprep.mubr.f32.mxu1 %v58_v10 }
  0x7f   :  { %286 = vmatmul.mubr.f32.gmra.mrb[10].mxu0 %v57_v11 }
  0x80   :  { %399 = vmatmul.mubr.f32.gmra.mrb[10].mxu1 %v57_v11  ;;  %291 = vmatprep.mubr.f32.mxu0 %v60_v12 }
  0x81   :  { %404 = vmatprep.mubr.f32.mxu1 %v60_v12 }
  0x83   :  { %292 = vmatmul.mubr.f32.gmra.mrb[12].mxu0 %v59_v13 }
  0x84   :  { %405 = vmatmul.mubr.f32.gmra.mrb[12].mxu1 %v59_v13  ;;  %297 = vmatprep.mubr.f32.mxu0 %v62_v14 }
  0x85   :  { %410 = vmatprep.mubr.f32.mxu1 %v62_v14 }
  0x87   :  { %298 = vmatmul.mubr.f32.gmra.mrb[14].mxu0 %v61_v15 }
  0x88   :  { %411 = vmatmul.mubr.f32.gmra.mrb[14].mxu1 %v61_v15  ;;  %547 = vmatprep.mubr.f32.mxu0 %v3634_v16 }
  0x89   :  { %618 = vmatprep.mubr.f32.mxu1 %v3634_v16 }
 0x13e   :  { %v3694_v17 = vpop.f32.mrb[0].mxu0 }
 0x13f   :  { %v3696_v18 = vpop.f32.mrb[0].mxu1  ;;  %v3698_v19 = vpop.f32.mrb[1].mxu0  ;;  %v3706_v22 = vmul.f32 %v3694_v17, %v3694_v17 }
 0x140   :  { %v3700_v20 = vpop.f32.mrb[1].mxu1  ;;  %v3716_v26 = vmul.f32 %v3698_v19, %v3698_v19  ;;  %v3724_v28 = vmul.f32 %v3696_v18, %v3696_v18 }
 0x141   :  { %v3744_v35 = vmul.f32 %v3700_v20, %v3700_v20 }
 0x142   :  { %v3702_v21 = vpop.f32.mrb[2].mxu0 }
 0x143   :  { %v3708_v23 = vpop.f32.mrb[2].mxu1  ;;  %v3710_v24 = vpop.f32.mrb[3].mxu0  ;;  %v3248_v25 = vpack.c.bf16 %v3702_v21, %v3694_v17  ;;  %v3720_v27 = vmul.f32 %v3702_v21, %v3702_v21 }
 0x144   :  { %v3726_v29 = vpop.f32.mrb[3].mxu1  ;;  %v3246_v30 = vpack.c.bf16 %v3710_v24, %v3698_v19  ;;  %v3252_v31 = vpack.c.bf16 %v3708_v23, %v3696_v18  ;;  %v3734_v32 = vmul.f32 %v3710_v24, %v3710_v24  ;;  %v3738_v33 = vmul.f32 %v3708_v23, %v3708_v23 }
 0x145   :  { %v3250_v34 = vpack.c.bf16 %v3726_v29, %v3700_v20  ;;  %v3748_v36 = vmul.f32 %v3726_v29, %v3726_v29  ;;  %v3264_v37 = vpack.c.bf16 %v3720_v27, %v3706_v22  ;;  %v4453_v22 = vmov 1.0|1.0  }
 0x146   :  { %v3752_v38 = vpop.f32.mrb[4].mxu0  ;;  %v3262_v39 = vpack.c.bf16 %v3734_v32, %v3716_v26 }
 0x147   :  { %v3758_v41 = vpop.f32.mrb[4].mxu1  ;;  %v3760_v42 = vpop.f32.mrb[5].mxu0  ;;  %v3266_v43 = vpack.c.bf16 %v3748_v36, %v3744_v35  ;;  %v3770_v46 = vmul.f32 %v3752_v38, %v3752_v38  ;;  %v4456_v36 = vpack.c.bf16 %v3738_v33, %v3724_v28 }
 0x148   :  { %v3764_v44 = vpop.f32.mrb[5].mxu1  ;;  %v768_v50 = vmul.f32 %v3760_v42, %v3760_v42  ;;  %v3786_v52 = vmul.f32 %v3758_v41, %v3758_v41 }
 0x149   :  { %v770_v59 = vmul.f32 %v3764_v44, %v3764_v44 }
 0x14a   :  { %v3766_v45 = vpop.f32.mrb[6].mxu0 }
 0x14b   :  { %v3772_v47 = vpop.f32.mrb[6].mxu1  ;;  %v3774_v48 = vpop.f32.mrb[7].mxu0  ;;  %v3240_v49 = vpack.c.bf16 %v3766_v45, %v3752_v38  ;;  %v3782_v51 = vmul.f32 %v3766_v45, %v3766_v45 }
 0x14c   :  { %v3788_v53 = vpop.f32.mrb[7].mxu1  ;;  %v3238_v54 = vpack.c.bf16 %v3774_v48, %v3760_v42  ;;  %v3244_v55 = vpack.c.bf16 %v3772_v47, %v3758_v41  ;;  %v772_v56 = vmul.f32 %v3774_v48, %v3774_v48  ;;  %v3798_v57 = vmul.f32 %v3772_v47, %v3772_v47 }
 0x14d   :  { %v3242_v58 = vpack.c.bf16 %v3788_v53, %v3764_v44  ;;  %v774_v60 = vmul.f32 %v3788_v53, %v3788_v53  ;;  %v3256_v61 = vpack.c.bf16 %v3782_v51, %v3770_v46 }
 0x14e   :  { %3239 = vmatprep.subr.bf16.mxu0 %v3238_v54  ;;  %v3254_v62 = vpack.c.bf16 %v772_v56, %v768_v50  ;;  %v3808_v63 = vpop.f32.mrb[8].mxu0  ;;  %v3260_v0 = vpack.c.bf16 %v3798_v57, %v3786_v52 }
 0x14f   :  { %3243 = vmatprep.subr.bf16.mxu1 %v3242_v58  ;;  %3241 = vmatpush1.bf16.msra.mxu0 %v3240_v49  ;;  %v3258_v1 = vpack.c.bf16 %v774_v60, %v770_v59  ;;  %v3812_v2 = vpop.f32.mrb[8].mxu1  ;;  %v3814_v3 = vpop.f32.mrb[9].mxu0  ;;  %v3820_v5 = vmul.f32 %v3808_v63, %v3808_v63 }
 0x150   :  { %3245 = vmatpush1.bf16.msra.mxu1 %v3244_v55  ;;  %3247 = vmatprep.subr.bf16.mxu0 %v3246_v30  ;;  %v3816_v4 = vpop.f32.mrb[9].mxu1  ;;  %v3828_v8 = vmul.f32 %v3814_v3, %v3814_v3  ;;  %v3832_v9 = vmul.f32 %v3812_v2, %v3812_v2 }
 0x151   :  { %3251 = vmatprep.subr.bf16.mxu1 %v3250_v34  ;;  %v3844_v13 = vmul.f32 %v3816_v4, %v3816_v4 }
 0x152   :  { %2789 = vmatmul.mubr.msk.f32.vlgmr.msra.gmra.mrb[16].mxu0 %vm479_vm0, %v3635_v6  ;;  %v3824_v7 = vpop.f32.mrb[10].mxu0 }
 0x153   :  { %2790 = vmatmul.mubr.msk.f32.vlgmr.msra.gmra.mrb[16].mxu1 %vm479_vm0, %v3635_v6  ;;  %3249 = vmatpush1.bf16.msra.mxu0 %v3248_v25  ;;  %v3836_v10 = vpop.f32.mrb[10].mxu1  ;;  %v3838_v11 = vpop.f32.mrb[11].mxu0  ;;  %v3272_v12 = vpack.c.bf16 %v3824_v7, %v3808_v63  ;;  %v3848_v14 = vmul.f32 %v3824_v7, %v3824_v7 }
 0x154   :  { %3253 = vmatpush1.bf16.msra.mxu1 %v3252_v31  ;;  %3255 = vmatprep.subr.bf16.mxu0 %v3254_v62  ;;  %v3850_v15 = vpop.f32.mrb[11].mxu1  ;;  %v3270_v25 = vpack.c.bf16 %v3838_v11, %v3814_v3  ;;  %v3276_v30 = vpack.c.bf16 %v3836_v10, %v3812_v2  ;;  %v1221_v34 = vmul.f32 %v3838_v11, %v3838_v11 }
 0x155   :  { %3259 = vmatprep.subr.bf16.mxu1 %v3258_v1  ;;  %689 = vmatprep.mubr.f32.mxu0 %v3634_v16  ;;  %v3274_v46 = vpack.c.bf16 %v3850_v15, %v3816_v4  ;;  %v1223_v31 = vmul.f32 %v3850_v15, %v3850_v15  ;;  %v3280_v49 = vpack.c.bf16 %v3848_v14, %v3820_v5 }
 0x156   :  { %760 = vmatprep.mubr.f32.mxu1 %v3634_v16  ;;  %v3866_v50 = vpop.f32.mrb[12].mxu0  ;;  %v3278_v51 = vpack.c.bf16 %v1221_v34, %v3828_v8  ;;  %v1222_v52 = vmul.f32 %v3836_v10, %v3836_v10 }
 0x157   :  { %v3871_v54 = vpop.f32.mrb[12].mxu1  ;;  %v3873_v55 = vpop.f32.mrb[13].mxu0  ;;  %v3282_v56 = vpack.c.bf16 %v1223_v31, %v3844_v13  ;;  %v1527_v59 = vmul.f32 %v3866_v50, %v3866_v50 }
 0x158   :  { %v3876_v57 = vpop.f32.mrb[13].mxu1  ;;  %v3284_v58 = vpack.c.bf16 %v1222_v52, %v3832_v9  ;;  %v1528_v62 = vmul.f32 %v3873_v55, %v3873_v55  ;;  %v1529_v1 = vmul.f32 %v3871_v54, %v3871_v54 }
 0x159   :  { %v1530_v13 = vmul.f32 %v3876_v57, %v3876_v57 }
 0x15a   :  { %2791 = vmatmul.mubr.msk.f32.vlgmr.msra.gmra.mrb[16].mxu0 %vm479_vm0, %v3635_v6  ;;  %v3883_v60 = vpop.f32.mrb[14].mxu0 }
 0x15b   :  { %2792 = vmatmul.mubr.msk.f32.vlgmr.msra.gmra.mrb[16].mxu1 %vm479_vm0, %v3635_v6  ;;  %3257 = vmatpush1.bf16.msra.mxu0 %v3256_v61  ;;  %v3891_v5 = vpop.f32.mrb[14].mxu1  ;;  %v3893_v8 = vpop.f32.mrb[15].mxu0  ;;  %v3288_v9 = vpack.c.bf16 %v3883_v60, %v3866_v50  ;;  %v1531_v14 = vmul.f32 %v3883_v60, %v3883_v60 }
 0x15c   :  { %3261 = vmatpush1.bf16.msra.mxu1 %v3260_v0  ;;  %3263 = vmatprep.subr.bf16.mxu0 %v3262_v39  ;;  %v3904_v34 = vpop.f32.mrb[15].mxu1  ;;  %v3286_v61 = vpack.c.bf16 %v3893_v8, %v3873_v55  ;;  %v3292_v31 = vpack.c.bf16 %v3891_v5, %v3871_v54  ;;  %v1532_v52 = vmul.f32 %v3893_v8, %v3893_v8 }
 0x15d   :  { %3267 = vmatprep.subr.bf16.mxu1 %v3266_v43  ;;  %839 = vmatprep.mubr.f32.mxu0 %v3634_v16  ;;  %v3290_v26 = vpack.c.bf16 %v3904_v34, %v3876_v57  ;;  %v1534_v32 = vmul.f32 %v3904_v34, %v3904_v34  ;;  %v3296_v39 = vpack.c.bf16 %v1531_v14, %v1527_v59 }
 0x15e   :  { %910 = vmatprep.mubr.f32.mxu1 %v3634_v16  ;;  %2793 = vmatmul.mubr.msk.f32.vlgmr.msra.gmra.mrb[18].mxu0 %vm479_vm0, %v3635_v6  ;;  %v3294_v0 = vpack.c.bf16 %v1532_v52, %v1528_v62  ;;  %v1533_v40 = vmul.f32 %v3891_v5, %v3891_v5 }
 0x15f   :  { %2794 = vmatmul.mubr.msk.f32.vlgmr.msra.gmra.mrb[18].mxu1 %vm479_vm0, %v3635_v6  ;;  %3265 = vmatpush1.bf16.msra.mxu0 %v3264_v37  ;;  %v3298_v35 = vpack.c.bf16 %v1534_v32, %v1530_v13 }
 0x160   :  { %3269 = vmatpush1.bf16.msra.mxu1 %v4456_v36  ;;  %981 = vmatprep.mubr.f32.mxu0 %v3634_v16  ;;  %v3300_v43 = vpack.c.bf16 %v1533_v40, %v1529_v1  ;;  %v1698_v36 = vld [vmem:[%s4450_s2] ss:$2 sm:$0xf] }
 0x161   :  { %1052 = vmatprep.mubr.f32.mxu1 %v3634_v16  ;;  %3271 = vmatprep.subr.bf16.mxu0 %v3270_v25 }
 0x162   :  { %3275 = vmatprep.subr.bf16.mxu1 %v3274_v46 }
 0x166   :  { %2795 = vmatmul.mubr.msk.f32.vlgmr.msra.gmra.mrb[18].mxu0 %vm479_vm0, %v3635_v6 }
 0x167   :  { %2796 = vmatmul.mubr.msk.f32.vlgmr.msra.gmra.mrb[18].mxu1 %vm479_vm0, %v3635_v6  ;;  %3273 = vmatpush1.bf16.msra.mxu0 %v3272_v12 }
 0x168   :  { %3277 = vmatpush1.bf16.msra.mxu1 %v3276_v30  ;;  %1134 = vmatprep.mubr.f32.mxu0 %v3634_v16 }
 0x169   :  { %1205 = vmatprep.mubr.f32.mxu1 %v3634_v16  ;;  %3279 = vmatprep.subr.bf16.mxu0 %v3278_v51 }
 0x16a   :  { %2797 = vmatmul.mubr.msk.f32.vlgmr.msra.gmra.mrb[16].mxu0 %vm479_vm0, %v3635_v6  ;;  %3283 = vmatprep.subr.bf16.mxu1 %v3282_v56 }
 0x16b   :  { %2798 = vmatmul.mubr.msk.f32.vlgmr.msra.gmra.mrb[16].mxu1 %vm479_vm0, %v3635_v6  ;;  %3281 = vmatpush1.bf16.msra.mxu0 %v3280_v49  ;;  %v1712_v49 = vlaneseq }
 0x16c   :  { %3285 = vmatpush1.bf16.msra.mxu1 %v3284_v58  ;;  %1288 = vmatprep.mubr.f32.mxu0 %v3634_v16 }
 0x16d   :  { %1359 = vmatprep.mubr.f32.mxu1 %v3634_v16  ;;  %3287 = vmatprep.subr.bf16.mxu0 %v3286_v61 }
 0x16e   :  { %2799 = vmatmul.mubr.msk.f32.vlgmr.msra.gmra.mrb[18].mxu0 %vm479_vm0, %v3635_v6  ;;  %3291 = vmatprep.subr.bf16.mxu1 %v3290_v26 }
 0x16f   :  { %2800 = vmatmul.mubr.msk.f32.vlgmr.msra.gmra.mrb[18].mxu1 %vm479_vm0, %v3635_v6  ;;  %3289 = vmatpush1.bf16.msra.mxu0 %v3288_v9 }
 0x170   :  { %3293 = vmatpush1.bf16.msra.mxu1 %v3292_v31  ;;  %1445 = vmatprep.mubr.f32.mxu0 %v3634_v16 }
 0x171   :  { %1516 = vmatprep.mubr.f32.mxu1 %v3634_v16  ;;  %3295 = vmatprep.subr.bf16.mxu0 %v3294_v0 }
 0x172   :  { %2801 = vmatmul.mubr.msk.f32.vlgmr.msra.gmra.mrb[16].mxu0 %vm479_vm0, %v3635_v6  ;;  %3299 = vmatprep.subr.bf16.mxu1 %v3298_v35 }
 0x173   :  { %2802 = vmatmul.mubr.msk.f32.vlgmr.msra.gmra.mrb[16].mxu1 %vm479_vm0, %v3635_v6  ;;  %3297 = vmatpush1.bf16.msra.mxu0 %v3296_v39  ;;  %v3997_v39 = vshrl.u32 %v1712_v49, 7 }
 0x174   :  { %3301 = vmatpush1.bf16.msra.mxu1 %v3300_v43  ;;  %1599 = vmatprep.mubr.f32.mxu0 %v3634_v16  ;;  %v1709_v43 = vstv %s4451_s3 }
 0x175   :  { %1670 = vmatprep.mubr.f32.mxu1 %v3634_v16  ;;  %3302 = vmatprep.subr.bf16.mxu0 %v4453_v22  ;;  %v1726_v49 = vsub.s32 3, %v3997_v39 }
 0x176   :  { %2803 = vmatmul.mubr.msk.f32.vlgmr.msra.gmra.mrb[18].mxu0 %vm479_vm0, %v3635_v6  ;;  %3318 = vmatprep.subr.bf16.mxu1 %v4453_v22 }
 0x177   :  { %2804 = vmatmul.mubr.msk.f32.vlgmr.msra.gmra.mrb[18].mxu1 %vm479_vm0, %v3635_v6  ;;  %3303 = vmatpush3.bf16.msra.mxu0 %v4453_v22 }
 0x178   :  { %3319 = vmatpush3.bf16.msra.mxu1 %v4453_v22  ;;  %3304 = vmatprep.subr.bf16.mxu0 %v4453_v22 }
 0x179   :  { %3320 = vmatprep.subr.bf16.mxu1 %v4453_v22 }
 0x17b   :  { %3305 = vmatpush3.bf16.msra.mxu0 %v4453_v22 }
 0x17c   :  { %3321 = vmatpush3.bf16.msra.mxu1 %v4453_v22  ;;  %3306 = vmatprep.subr.bf16.mxu0 %v4453_v22 }
 0x17d   :  { %3322 = vmatprep.subr.bf16.mxu1 %v4453_v22 }
 0x17f   :  { %3307 = vmatpush3.bf16.msra.mxu0 %v4453_v22 }
 0x180   :  { %3323 = vmatpush3.bf16.msra.mxu1 %v4453_v22  ;;  %3308 = vmatprep.subr.bf16.mxu0 %v4453_v22 }
 0x181   :  { %3324 = vmatprep.subr.bf16.mxu1 %v4453_v22 }
 0x183   :  { %3309 = vmatpush3.bf16.msra.mxu0 %v4453_v22 }
 0x184   :  { %3325 = vmatpush3.bf16.msra.mxu1 %v4453_v22  ;;  %3310 = vmatprep.subr.bf16.mxu0 %v4453_v22 }
 0x185   :  { %3326 = vmatprep.subr.bf16.mxu1 %v4453_v22 }
 0x187   :  { %3311 = vmatpush3.bf16.msra.mxu0 %v4453_v22 }
 0x188   :  { %3327 = vmatpush3.bf16.msra.mxu1 %v4453_v22  ;;  %3312 = vmatprep.subr.bf16.mxu0 %v4453_v22 }
 0x189   :  { %3328 = vmatprep.subr.bf16.mxu1 %v4453_v22 }
 0x18b   :  { %3313 = vmatpush3.bf16.msra.mxu0 %v4453_v22 }
 0x18c   :  { %3329 = vmatpush3.bf16.msra.mxu1 %v4453_v22  ;;  %3314 = vmatprep.subr.bf16.mxu0 %v4453_v22 }
 0x18d   :  { %3330 = vmatprep.subr.bf16.mxu1 %v4453_v22 }
 0x18f   :  { %3315 = vmatpush3.bf16.msra.mxu0 %v4453_v22 }
 0x190   :  { %3331 = vmatpush3.bf16.msra.mxu1 %v4453_v22  ;;  %3316 = vmatprep.subr.bf16.mxu0 %v4453_v22 }
 0x191   :  { %3332 = vmatprep.subr.bf16.mxu1 %v4453_v22 }
 0x193   :  { %3317 = vmatpush3.bf16.msra.mxu0 %v4453_v22 }
 0x194   :  { %3333 = vmatpush3.bf16.msra.mxu1 %v4453_v22  ;;  %3334 = vmatprep.subr.bf16.mxu0 %v4453_v22 }
 0x195   :  { %3350 = vmatprep.subr.bf16.mxu1 %v4453_v22 }
 0x245   :  { %v1447_v16 = vpop.f32.mrb[16].mxu0 }
 0x246   :  { %v1681_v27 = vmul.f32 0.015625, %v1447_v16  ;;  %v1518_v28 = vpop.f32.mrb[16].mxu1  ;;  %v1449_v33 = vpop.f32.mrb[17].mxu0 }
 0x247   :  { %v1683_v37 = vmul.f32 0.015625, %v1518_v28  ;;  %v1682_v40 = vmul.f32 0.015625, %v1449_v33  ;;  %v1520_v6 = vpop.f32.mrb[17].mxu1  ;;  %v1710_v28 = vmul.f32 %v1709_v43, %v1698_v36  ;;  %v4006_v33 = vsub.s32 0, %v3997_v39 }
 0x248   :  { %v1684_v12 = vmul.f32 0.015625, %v1520_v6  ;;  %v1689_v30 = vmul.f32 %v1681_v27, %v1681_v27  ;;  %v4455_v6 = vsub.s32 2, %v3997_v39 }
 0x249   :  { %v1601_v25 = vpop.f32.mrb[18].mxu0  ;;  %v1691_v58 = vmul.f32 %v1683_v37, %v1683_v37  ;;  %v1690_v59 = vmul.f32 %v1682_v40, %v1682_v40 }
 0x24a   :  { %v1685_v46 = vmul.f32 0.015625, %v1601_v25  ;;  %v1672_v51 = vpop.f32.mrb[18].mxu1  ;;  %v1603_v56 = vpop.f32.mrb[19].mxu0  ;;  %v1692_v13 = vmul.f32 %v1684_v12, %v1684_v12  ;;  %v1718_v25 = vsub.s32 1, %v3997_v39 }
 0x24b   :  { %v1687_v62 = vmul.f32 0.015625, %v1672_v51  ;;  %v1686_v1 = vmul.f32 0.015625, %v1603_v56  ;;  %v1674_v9 = vpop.f32.mrb[19].mxu1  ;;  %v1715_v51 = vrot.slane %v1710_v28, %v4006_v33  ;;  %v1723_v56 = vrot.slane %v1710_v28, %v4455_v6 }
 0x24c   :  { %v1693_v14 = vsub.f32 %v1685_v46, %v1689_v30  ;;  %v1688_v61 = vmul.f32 0.015625, %v1674_v9  ;;  %v3637_v30 = vmov 1966171168   ;;  %v1727_v9 = vrot.slane %v1710_v28, %v1726_v49 }
 0x24d   :  { %v1695_v31 = vsub.f32 %v1687_v62, %v1691_v58  ;;  %v1694_v52 = vsub.f32 %v1686_v1, %v1690_v59  ;;  %v1748_v46 = vunpack.c.l.s4 %v3637_v30  ;;  %v1719_v58 = vrot.slane %v1710_v28, %v1718_v25  ;;  %v2805_v62 = vld [vmem:[%s4450_s2 + $0x1] ss:$2 sm:$0xf]  ;;  %s3639_s2 = smov [#allocation8]  }
 0x24e   :  { %v1701_v26 = vadd.f32 1e-05, %v1693_v14  ;;  %v1696_v32 = vsub.f32 %v1688_v61, %v1692_v13  ;;  %s2773_s20 = sshll.u32 %s3639_s2, 4  ;;  %s2774_s20 = int_to_ptr.vmem [resolvable:$true] %s2773_s20 }
 0x24f   :  { %v1703_v0 = vadd.f32 1e-05, %v1695_v31  ;;  %v1702_v35 = vadd.f32 1e-05, %v1694_v52  ;;  %v1749_v1 = vunpack.c.0.s8 %v1748_v46  ;;  %s3600_s21 = scalar_lea.vmem %s2774_s20, 4096  ;;  %p3605_p3 = scmp.lt.s32.totalorder %s2774_s20, %s2774_s20 }
 0x250   :  { %3468 = vrsqrt.f32 %v1701_v26  ;;  %v1704_v16 = vadd.f32 1e-05, %v1696_v32  ;;  %v1736_v26 = vmul.f32 %v2805_v62, %v1709_v43  ;;  %p3601_p2 = scmp.ne.s32.totalorder %s2774_s20, %s3600_s21  ;;  %p3606_p4 = scmp.lt.s32.totalorder %s3600_s21, %s3600_s21 }
 0x251   :  { %3470 = vrsqrt.f32 %v1703_v0  ;;  %v1752_v30 = vsub.s32 %v1749_v1, %v3997_v39 }
 0x252   :  { %3472 = vrsqrt.f32 %v1702_v35  ;;  %p3607_p5 = por %p3606_p4, %p3605_p3 }
 0x253   :  { %3474 = vrsqrt.f32 %v1704_v16 }
 0x254   :  { %p3608_p6 = pnand %p3607_p5, %p3601_p2 }
 0x25a   :  { %v3469_v59 = vpop.eup %3468 }
 0x25b   :  { %v3471_v13 = vpop.eup %3470  ;;  %v1732_v14 = vmul.f32 %v3469_v59, %v1715_v51 }
 0x25c   :  { %v3473_v61 = vpop.eup %3472  ;;  %v1734_v31 = vmul.f32 %v3471_v13, %v1723_v56 }
 0x25d   :  { %v3475_v52 = vpop.eup %3474  ;;  %v1737_v32 = vmul.f32 %v1732_v14, %v1681_v27  ;;  %v1774_v0 = vrot.slane %v1732_v14, %v4006_v33  ;;  %v1733_v35 = vmul.f32 %v3473_v61, %v1719_v58 }
 0x25e   :  { %v1739_v36 = vmul.f32 %v1734_v31, %v1683_v37  ;;  %v1782_v16 = vrot.slane %v1734_v31, %v4006_v33  ;;  %v1735_v22 = vmul.f32 %v3475_v52, %v1727_v9 }
 0x25f   :  { %v1738_v46 = vmul.f32 %v1733_v35, %v1682_v40  ;;  %v1778_v6 = vrot.slane %v1733_v35, %v4006_v33  ;;  %v2050_v28 = vmul.f32 %v1774_v0, %v3752_v38  ;;  %v1787_v51 = vmul.f32 %v1774_v0, %v3694_v17 }
 0x260   :  { %v1740_v56 = vmul.f32 %v1735_v22, %v1684_v12  ;;  %v1786_v43 = vrot.slane %v1735_v22, %v4006_v33  ;;  %v2052_v27 = vmul.f32 %v1782_v16, %v3758_v41  ;;  %v1789_v58 = vmul.f32 %v1782_v16, %v3696_v18 }
 0x261   :  { %v1745_v37 = vcombine.low %v1737_v32, %v1738_v46  ;;  %v2051_v59 = vmul.f32 %v1778_v6, %v3760_v42  ;;  %v1788_v62 = vmul.f32 %v1778_v6, %v3698_v19  ;;  %v2054_v40 = vmul.f32 %v1774_v0, %v3766_v45 }
 0x262   :  { %v1746_v1 = vcombine.low %v1739_v36, %v1740_v56  ;;  %v2053_v9 = vmul.f32 %v1786_v43, %v3764_v44  ;;  %v1790_v38 = vmul.f32 %v1786_v43, %v3700_v20  ;;  %v2055_v17 = vmul.f32 %v1778_v6, %v3774_v48 }
 0x263   :  { %v1753_v12 = vrot.slane %v1745_v37, %v1752_v30  ;;  %v2056_v22 = vmul.f32 %v1782_v16, %v3772_v47  ;;  %v2057_v41 = vmul.f32 %v1786_v43, %v3788_v53  ;;  %v1791_v18 = vmul.f32 %v1774_v0, %v3702_v21 }
 0x264   :  { %v1760_v13 = vrot.slane %v1746_v1, %v1752_v30  ;;  %v1792_v42 = vmul.f32 %v1778_v6, %v3710_v24  ;;  %v1793_v19 = vmul.f32 %v1782_v16, %v3708_v23  ;;  %v1794_v45 = vmul.f32 %v1786_v43, %v3726_v29 }
 0x265   :  { %v2296_v44 = vmul.f32 %v1774_v0, %v3824_v7  ;;  %v2297_v20 = vmul.f32 %v1778_v6, %v3838_v11  ;;  %v2298_v48 = vmul.f32 %v1782_v16, %v3836_v10  ;;  %v2299_v14 = vmul.f32 %v1786_v43, %v3850_v15 }
 0x266   :  { %v1761_v47 = vcombine.low %v1753_v12, %v1760_v13  ;;  %v2292_v53 = vmul.f32 %v1774_v0, %v3808_v63  ;;  %v2293_v21 = vmul.f32 %v1778_v6, %v3814_v3  ;;  %v2294_v61 = vmul.f32 %v1782_v16, %v3812_v2 }
 0x267   :  { %v2295_v24 = vmul.f32 %v1786_v43, %v3816_v4  ;;  %v2538_v23 = vmul.f32 %v1774_v0, %v3883_v60  ;;  %v2539_v29 = vmul.f32 %v1778_v6, %v3893_v8  ;;  %v2540_v7 = vmul.f32 %v1782_v16, %v3891_v5 }
 0x268   :  { %v1768_v11 = vrot.slane %v1761_v47, %v1752_v30  ;;  %v2541_v10 = vmul.f32 %v1786_v43, %v3904_v34  ;;  %v2534_v15 = vmul.f32 %v1774_v0, %v3866_v50  ;;  %v2535_v31 = vmul.f32 %v1778_v6, %v3873_v55 }
 0x269   :  { %v2536_v63 = vmul.f32 %v1782_v16, %v3871_v54  ;;  %v2537_v3 = vmul.f32 %v1786_v43, %v3876_v57  ;;  %v4457_v8 = vsub.s32 2, %v3997_v39 }
 0x26a   :  { %v1770_v2 = vsub.f32 %v1736_v26, %v1768_v11 }
 0x26c   :  { %v1799_v4 = vrot.slane %v1770_v2, %v4006_v33  ;;  %v1803_v60 = vrot.slane %v1770_v2, %v1718_v25  ;;  %v1807_v5 = vrot.slane %v1770_v2, %v4457_v8  ;;  %v1811_v34 = vrot.slane %v1770_v2, %v1726_v49 }
 0x26e   :  { %v4065_v52 = vadd.f32 %v2050_v28, %v1799_v4  ;;  %v4067_v50 = vadd.f32 %v2051_v59, %v1803_v60  ;;  %v4069_v55 = vadd.f32 %v2052_v27, %v1807_v5  ;;  %v4071_v54 = vadd.f32 %v2053_v9, %v1811_v34 }
 0x26f   :  { %v4073_v57 = vadd.f32 %v1799_v4, %v1787_v51  ;;  %v4075_v33 = vadd.f32 %v1803_v60, %v1788_v62  ;;  %v4077_v6 = vadd.f32 %v1807_v5, %v1789_v58  ;;  %v4079_v25 = vadd.f32 %v1811_v34, %v1790_v38 }
 0x270   :  { %v2066_v39 = vmax.f32 %v4065_v52, %v4069_v55  ;;  %v2067_v49 = vmax.f32 %v4067_v50, %v4071_v54  ;;  %v4085_v26 = vadd.f32 %v2054_v40, %v1799_v4  ;;  %v4087_v32 = vadd.f32 %v2055_v17, %v1803_v60 }
 0x271   :  { %v1824_v0 = vmax.f32 %v4073_v57, %v4077_v6  ;;  %v1825_v35 = vmax.f32 %v4075_v33, %v4079_v25  ;;  %v4093_v36 = vadd.f32 %v2056_v22, %v1807_v5  ;;  %v4095_v16 = vadd.f32 %v2057_v41, %v1811_v34 }
 0x272   :  { %v2068_v30 = vmax.f32 %v2066_v39, %v2067_v49  ;;  %v4097_v46 = vadd.f32 %v1799_v4, %v1791_v18  ;;  %v4099_v28 = vadd.f32 %v1803_v60, %v1792_v42  ;;  %v4101_v51 = vadd.f32 %v1807_v5, %v1793_v19 }
 0x273   :  { %v1826_v56 = vmax.f32 %v1824_v0, %v1825_v35  ;;  %v2071_v43 = vmax.f32 %v4085_v26, %v4093_v36  ;;  %v2072_v27 = vmax.f32 %v4087_v32, %v4095_v16  ;;  %v4107_v58 = vadd.f32 %v1811_v34, %v1794_v45 }
 0x274   :  { %2069 = vmax.xlane.f32.xlu1 %v2068_v30  ;;  %v1829_v37 = vmax.f32 %v4097_v46, %v4101_v51  ;;  %v4111_v59 = vadd.f32 %v2296_v44, %v1799_v4  ;;  %v4113_v62 = vadd.f32 %v2297_v20, %v1803_v60  ;;  %v4115_v40 = vadd.f32 %v2298_v48, %v1807_v5 }
 0x275   :  { %1827 = vmax.xlane.f32.xlu0 %v1826_v56  ;;  %v2073_v1 = vmax.f32 %v2071_v43, %v2072_v27  ;;  %v1830_v9 = vmax.f32 %v4099_v28, %v4107_v58  ;;  %v4119_v38 = vadd.f32 %v2299_v14, %v1811_v34  ;;  %v4121_v17 = vadd.f32 %v2292_v53, %v1799_v4 }
 0x276   :  { %v2313_v12 = vmax.f32 %v4111_v59, %v4115_v40  ;;  %v4125_v22 = vadd.f32 %v2293_v21, %v1803_v60  ;;  %v4127_v41 = vadd.f32 %v2294_v61, %v1807_v5  ;;  %v4129_v18 = vadd.f32 %v2295_v24, %v1811_v34 }
 0x277   :  { %v1831_v13 = vmax.f32 %v1829_v37, %v1830_v9  ;;  %v2314_v42 = vmax.f32 %v4113_v62, %v4119_v38  ;;  %v4133_v19 = vadd.f32 %v2538_v23, %v1799_v4  ;;  %v4135_v45 = vadd.f32 %v2539_v29, %v1803_v60 }
 0x278   :  { %2074 = vmax.xlane.f32.xlu1 %v2073_v1  ;;  %v2308_v44 = vmax.f32 %v4121_v17, %v4127_v41  ;;  %v2309_v20 = vmax.f32 %v4125_v22, %v4129_v18  ;;  %v4141_v48 = vadd.f32 %v2540_v7, %v1807_v5  ;;  %v4143_v14 = vadd.f32 %v2541_v10, %v1811_v34 }
 0x279   :  { %1832 = vmax.xlane.f32.xlu0 %v1831_v13  ;;  %v4145_v47 = vadd.f32 %v2534_v15, %v1799_v4  ;;  %v4147_v53 = vadd.f32 %v2535_v31, %v1803_v60  ;;  %v4149_v21 = vadd.f32 %v2536_v63, %v1807_v5  ;;  %v2315_v61 = vmax.f32 %v2313_v12, %v2314_v42 }
 0x27a   :  { %v2555_v24 = vmax.f32 %v4133_v19, %v4141_v48  ;;  %v2556_v23 = vmax.f32 %v4135_v45, %v4143_v14  ;;  %v4155_v29 = vadd.f32 %v2537_v3, %v1811_v34  ;;  %v2310_v7 = vmax.f32 %v2308_v44, %v2309_v20 }
 0x27b   :  { %v2550_v11 = vmax.f32 %v4145_v47, %v4149_v21 }
 0x27c   :  { %2316 = vmax.xlane.f32.xlu1 %v2315_v61  ;;  %v2551_v10 = vmax.f32 %v4147_v53, %v4155_v29  ;;  %v2557_v15 = vmax.f32 %v2555_v24, %v2556_v23 }
 0x27d   :  { %2311 = vmax.xlane.f32.xlu0 %v2310_v7 }
 0x27e   :  { %v2552_v31 = vmax.f32 %v2550_v11, %v2551_v10 }
 0x280   :  { %2558 = vmax.xlane.f32.xlu1 %v2557_v15 }
 0x281   :  { %2553 = vmax.xlane.f32.xlu0 %v2552_v31 }
 0x301   :  { %v4165_v8 = vpop.xlane.xlu1 %2069 }
 0x302   :  { %v1828_v63 = vpop.xlane.xlu0 %1827  ;;  %v2077_v0 = vsub.f32 %v4067_v50, %v4165_v8  ;;  %v2079_v43 = vsub.f32 %v4071_v54, %v4165_v8  ;;  %v4458_v54 = vmov 1.0|1.0   ;;  %v2076_v24 = vsub.f32 %v4065_v52, %v4165_v8 }
 0x303   :  { %v1834_v2 = vsub.f32 %v4073_v57, %v1828_v63  ;;  %v1835_v4 = vsub.f32 %v4075_v33, %v1828_v63  ;;  %v1836_v3 = vsub.f32 %v4077_v6, %v1828_v63  ;;  %v1837_v60 = vsub.f32 %v4079_v25, %v1828_v63 }
 0x304   :  { %v2086_v6 = vmul.f32 1.442695, %v2077_v0  ;;  %v2078_v23 = vsub.f32 %v4069_v55, %v4165_v8  ;;  %v2084_v15 = vmul.f32 1.442695, %v2076_v24 }
 0x305   :  { %v1842_v5 = vmul.f32 1.442695, %v1834_v2  ;;  %v1844_v34 = vmul.f32 1.442695, %v1835_v4  ;;  %v1846_v49 = vmul.f32 1.442695, %v1836_v3  ;;  %v2075_v61 = vpop.xlane.xlu1 %2074 }
 0x306   :  { %v1833_v39 = vpop.xlane.xlu0 %1832  ;;  %v1848_v35 = vmul.f32 1.442695, %v1837_v60  ;;  %v2081_v7 = vsub.f32 %v4087_v32, %v2075_v61  ;;  %v2083_v11 = vsub.f32 %v4095_v16, %v2075_v61  ;;  %v2080_v52 = vsub.f32 %v4085_v26, %v2075_v61 }
 0x307   :  { %3476 = vpow2.f32 %v1842_v5  ;;  %v1838_v30 = vsub.f32 %v4097_v46, %v1833_v39  ;;  %v1839_v57 = vsub.f32 %v4099_v28, %v1833_v39  ;;  %v1840_v33 = vsub.f32 %v4101_v51, %v1833_v39 }
 0x308   :  { %3478 = vpow2.f32 %v1844_v34  ;;  %v1841_v25 = vsub.f32 %v4107_v58, %v1833_v39  ;;  %v2090_v46 = vmul.f32 1.442695, %v2079_v43  ;;  %v2088_v31 = vmul.f32 1.442695, %v2078_v23 }
 0x309   :  { %3480 = vpow2.f32 %v1846_v49  ;;  %v1850_v56 = vmul.f32 1.442695, %v1838_v30  ;;  %v1852_v27 = vmul.f32 1.442695, %v1839_v57  ;;  %v1854_v50 = vmul.f32 1.442695, %v1840_v33  ;;  %v2317_v0 = vpop.xlane.xlu1 %2316 }
 0x30a   :  { %3482 = vpow2.f32 %v1848_v35  ;;  %v1856_v37 = vmul.f32 1.442695, %v1841_v25  ;;  %v4226_v10 = vpop.xlane.xlu0 %2311  ;;  %v2082_v55 = vsub.f32 %v4093_v36, %v2075_v61  ;;  %v2094_v63 = vmul.f32 1.442695, %v2081_v7 }
 0x30b   :  { %3484 = vpow2.f32 %v2086_v6  ;;  %v2319_v32 = vsub.f32 %v4125_v22, %v4226_v10  ;;  %v2098_v16 = vmul.f32 1.442695, %v2083_v11  ;;  %v2321_v2 = vsub.f32 %v4129_v18, %v4226_v10 }
 0x30c   :  { %3486 = vpow2.f32 %v1850_v56  ;;  %v2092_v26 = vmul.f32 1.442695, %v2080_v52  ;;  %v2096_v36 = vmul.f32 1.442695, %v2082_v55  ;;  %v2323_v35 = vsub.f32 %v4113_v62, %v2317_v0 }
 0x30d   :  { %3488 = vpow2.f32 %v1852_v27  ;;  %v2328_v4 = vmul.f32 1.442695, %v2319_v32  ;;  %v2332_v22 = vmul.f32 1.442695, %v2321_v2  ;;  %v2318_v30 = vsub.f32 %v4121_v17, %v4226_v10 }
 0x30e   :  { %3490 = vpow2.f32 %v1854_v50  ;;  %v2320_v57 = vsub.f32 %v4127_v41, %v4226_v10  ;;  %v2325_v33 = vsub.f32 %v4119_v38, %v2317_v0  ;;  %v4296_v6 = vpop.xlane.xlu0 %2553  ;;  %v2322_v62 = vsub.f32 %v4111_v59, %v2317_v0  ;;  %v2559_v10 = vpop.xlane.xlu1 %2558 }
 0x30f   :  { %3492 = vpow2.f32 %v1856_v37  ;;  %v2336_v25 = vmul.f32 1.442695, %v2323_v35  ;;  %v2324_v17 = vsub.f32 %v4115_v40, %v2317_v0  ;;  %v2326_v56 = vmul.f32 1.442695, %v2318_v30 }
 0x310   :  { %3494 = vpow2.f32 %v2090_v46  ;;  %v2330_v43 = vmul.f32 1.442695, %v2320_v57  ;;  %v2561_v41 = vsub.f32 %v4147_v53, %v4296_v6  ;;  %v2340_v38 = vmul.f32 1.442695, %v2325_v33 }
 0x311   :  { %v4175_v1 = vpop.eup %3476  ;;  %3496 = vpow2.f32 %v2084_v15  ;;  %v2563_v27 = vsub.f32 %v4155_v29, %v4296_v6  ;;  %v2334_v59 = vmul.f32 1.442695, %v2322_v62  ;;  %v2338_v40 = vmul.f32 1.442695, %v2324_v17 }
 0x312   :  { %v4177_v28 = vpop.eup %3478  ;;  %3498 = vpow2.f32 %v2088_v31  ;;  %v2570_v50 = vmul.f32 1.442695, %v2561_v41  ;;  %v2565_v15 = vsub.f32 %v4135_v45, %v2559_v10  ;;  %v2560_v52 = vsub.f32 %v4145_v47, %v4296_v6 }
 0x313   :  { %v4179_v51 = vpop.eup %3480  ;;  %1922 = vmatprep.mubr.f32.mxu0 %v4177_v28  ;;  %3500 = vpow2.f32 %v2094_v63  ;;  %v2574_v53 = vmul.f32 1.442695, %v2563_v27  ;;  %v2562_v31 = vsub.f32 %v4149_v21, %v4296_v6  ;;  %v2567_v55 = vsub.f32 %v4143_v14, %v2559_v10 }
 0x314   :  { %v4182_v58 = vpop.eup %3482  ;;  %1923 = vmatmul.mubr.f32.vlgmr.msra.gmra.mrb[20].mxu0 %v4175_v1  ;;  %3502 = vpow2.f32 %v2098_v16  ;;  %v2578_v63 = vmul.f32 1.442695, %v2565_v15  ;;  %v2564_v32 = vsub.f32 %v4133_v19, %v2559_v10  ;;  %v2568_v45 = vmul.f32 1.442695, %v2560_v52 }
 0x315   :  { %1997 = vmatprep.mubr.f32.mxu1 %v4182_v58  ;;  %3335 = vmatpush3.bf16.msra.mxu0 %v4458_v54  ;;  %v4190_v9 = vpop.eup %3484  ;;  %3504 = vpow2.f32 %v2092_v26  ;;  %v2566_v47 = vsub.f32 %v4141_v48, %v2559_v10  ;;  %v2572_v16 = vmul.f32 1.442695, %v2562_v31  ;;  %v2582_v21 = vmul.f32 1.442695, %v2567_v55 }
 0x316   :  { %1998 = vmatmul.mubr.f32.vlgmr.msra.gmra.mrb[20].mxu1 %v4179_v51  ;;  %3336 = vmatprep.subr.bf16.mxu0 %v4458_v54  ;;  %v4193_v12 = vpop.eup %3486  ;;  %3506 = vpow2.f32 %v2096_v36  ;;  %v2576_v14 = vmul.f32 1.442695, %v2564_v32 }
 0x317   :  { %3351 = vmatpush3.bf16.msra.mxu1 %v4458_v54  ;;  %v4196_v13 = vpop.eup %3488  ;;  %3508 = vpow2.f32 %v2328_v4  ;;  %v2580_v2 = vmul.f32 1.442695, %v2566_v47 }
 0x318   :  { %3352 = vmatprep.subr.bf16.mxu1 %v4458_v54  ;;  %v4199_v42 = vpop.eup %3490  ;;  %1927 = vmatprep.mubr.f32.mxu0 %v4196_v13  ;;  %3510 = vpow2.f32 %v2332_v22 }
 0x319   :  { %3337 = vmatpush3.bf16.msra.mxu0 %v4458_v54  ;;  %v4203_v44 = vpop.eup %3492  ;;  %3512 = vpow2.f32 %v2336_v25 }
 0x31a   :  { %3338 = vmatprep.subr.bf16.mxu0 %v4458_v54  ;;  %1928 = vmatmul.mubr.f32.gmra.mrb[22].mxu0 %v4193_v12  ;;  %v4209_v20 = vpop.eup %3494  ;;  %3514 = vpow2.f32 %v2326_v56 }
 0x31b   :  { %3353 = vmatpush3.bf16.msra.mxu1 %v4458_v54  ;;  %2002 = vmatprep.mubr.f32.mxu1 %v4203_v44  ;;  %v4248_v18 = vpop.eup %3496  ;;  %3516 = vpow2.f32 %v2330_v43 }
 0x31c   :  { %3354 = vmatprep.subr.bf16.mxu1 %v4458_v54  ;;  %2164 = vmatprep.mubr.f32.mxu0 %v4190_v9  ;;  %v4252_v3 = vpop.eup %3498  ;;  %3518 = vpow2.f32 %v2340_v38 }
 0x31d   :  { %2003 = vmatmul.mubr.f32.gmra.mrb[22].mxu1 %v4199_v42  ;;  %3339 = vmatpush3.bf16.msra.mxu0 %v4458_v54  ;;  %v4255_v60 = vpop.eup %3500  ;;  %3520 = vpow2.f32 %v2334_v59 }
 0x31e   :  { %2239 = vmatprep.mubr.f32.mxu1 %v4209_v20  ;;  %3340 = vmatprep.subr.bf16.mxu0 %v4458_v54  ;;  %v4258_v8 = vpop.eup %3502  ;;  %3522 = vpow2.f32 %v2338_v40 }
 0x31f   :  { %3355 = vmatpush3.bf16.msra.mxu1 %v4458_v54  ;;  %v4262_v5 = vpop.eup %3504  ;;  %3524 = vpow2.f32 %v2570_v50 }
 0x320   :  { %3356 = vmatprep.subr.bf16.mxu1 %v4458_v54  ;;  %v4266_v34 = vpop.eup %3506  ;;  %3526 = vpow2.f32 %v2574_v53 }
 0x321   :  { %3341 = vmatpush3.bf16.msra.mxu0 %v4458_v54  ;;  %v4270_v39 = vpop.eup %3508  ;;  %3528 = vpow2.f32 %v2578_v63 }
 0x322   :  { %3342 = vmatprep.subr.bf16.mxu0 %v4458_v54  ;;  %v4274_v49 = vpop.eup %3510  ;;  %3530 = vpow2.f32 %v2568_v45 }
 0x323   :  { %3357 = vmatpush3.bf16.msra.mxu1 %v4458_v54  ;;  %v4318_v29 = vpop.eup %3512  ;;  %3532 = vpow2.f32 %v2572_v16 }
 0x324   :  { %3358 = vmatprep.subr.bf16.mxu1 %v4458_v54  ;;  %v4322_v37 = vpop.eup %3514  ;;  %3534 = vpow2.f32 %v2582_v21 }
 0x325   :  { %3343 = vmatpush3.bf16.msra.mxu0 %v4458_v54  ;;  %v4325_v46 = vpop.eup %3516  ;;  %3536 = vpow2.f32 %v2576_v14 }
 0x326   :  { %3344 = vmatprep.subr.bf16.mxu0 %v4458_v54  ;;  %v4328_v61 = vpop.eup %3518  ;;  %3538 = vpow2.f32 %v2580_v2 }
 0x327   :  { %3359 = vmatpush3.bf16.msra.mxu1 %v4458_v54  ;;  %v4332_v24 = vpop.eup %3520 }
 0x328   :  { %3360 = vmatprep.subr.bf16.mxu1 %v4458_v54  ;;  %v4336_v23 = vpop.eup %3522 }
 0x329   :  { %3345 = vmatpush3.bf16.msra.mxu0 %v4458_v54  ;;  %v4340_v7 = vpop.eup %3524 }
 0x32a   :  { %3346 = vmatprep.subr.bf16.mxu0 %v4458_v54  ;;  %v4344_v11 = vpop.eup %3526 }
 0x32b   :  { %3361 = vmatpush3.bf16.msra.mxu1 %v4458_v54  ;;  %v4382_v19 = vpop.eup %3528 }
 0x32c   :  { %3362 = vmatprep.subr.bf16.mxu1 %v4458_v54  ;;  %v4385_v48 = vpop.eup %3530 }
 0x32d   :  { %3347 = vmatpush3.bf16.msra.mxu0 %v4458_v54  ;;  %v4387_v26 = vpop.eup %3532 }
 0x32e   :  { %3348 = vmatprep.subr.bf16.mxu0 %v4458_v54  ;;  %v4390_v36 = vpop.eup %3534 }
 0x32f   :  { %3363 = vmatpush3.bf16.msra.mxu1 %v4458_v54  ;;  %v4395_v4 = vpop.eup %3536 }
 0x330   :  { %3364 = vmatprep.subr.bf16.mxu1 %v4458_v54  ;;  %v4397_v22 = vpop.eup %3538 }
 0x331   :  { %3349 = vmatpush3.bf16.msra.mxu0 %v4458_v54 }
 0x332   :  { %3366 = vmatprep.subr.bf16.mxu0 %v4458_v54 }
 0x333   :  { %3365 = vmatpush3.bf16.msra.mxu1 %v4458_v54 }
 0x334   :  { %3382 = vmatprep.subr.bf16.mxu1 %v4458_v54  ;;  %2165 = vmatmul.mubr.f32.vlgmr.msra.gmra.mrb[24].mxu0 %v4248_v18 }
 0x335   :  { %2169 = vmatprep.mubr.f32.mxu0 %v4255_v60  ;;  %3367 = vmatpush3.bf16.msra.mxu0 %v4458_v54 }
 0x336   :  { %2240 = vmatmul.mubr.f32.vlgmr.msra.gmra.mrb[24].mxu1 %v4252_v3  ;;  %3368 = vmatprep.subr.bf16.mxu0 %v4458_v54 }
 0x337   :  { %2244 = vmatprep.mubr.f32.mxu1 %v4258_v8  ;;  %3383 = vmatpush3.bf16.msra.mxu1 %v4458_v54 }
 0x338   :  { %2170 = vmatmul.mubr.f32.gmra.mrb[26].mxu0 %v4262_v5  ;;  %3384 = vmatprep.subr.bf16.mxu1 %v4458_v54 }
 0x339   :  { %2406 = vmatprep.mubr.f32.mxu0 %v4270_v39  ;;  %3369 = vmatpush3.bf16.msra.mxu0 %v4458_v54 }
 0x33a   :  { %2245 = vmatmul.mubr.f32.gmra.mrb[26].mxu1 %v4266_v34  ;;  %3370 = vmatprep.subr.bf16.mxu0 %v4458_v54 }
 0x33b   :  { %2481 = vmatprep.mubr.f32.mxu1 %v4274_v49  ;;  %3385 = vmatpush3.bf16.msra.mxu1 %v4458_v54 }
 0x33c   :  { %3386 = vmatprep.subr.bf16.mxu1 %v4458_v54 }
 0x33d   :  { %3371 = vmatpush3.bf16.msra.mxu0 %v4458_v54 }
 0x33e   :  { %3372 = vmatprep.subr.bf16.mxu0 %v4458_v54 }
 0x33f   :  { %3387 = vmatpush3.bf16.msra.mxu1 %v4458_v54 }
 0x340   :  { %3388 = vmatprep.subr.bf16.mxu1 %v4458_v54 }
 0x341   :  { %3373 = vmatpush3.bf16.msra.mxu0 %v4458_v54 }
 0x342   :  { %3374 = vmatprep.subr.bf16.mxu0 %v4458_v54 }
 0x343   :  { %3389 = vmatpush3.bf16.msra.mxu1 %v4458_v54 }
 0x344   :  { %3390 = vmatprep.subr.bf16.mxu1 %v4458_v54 }
 0x345   :  { %3375 = vmatpush3.bf16.msra.mxu0 %v4458_v54 }
 0x346   :  { %3376 = vmatprep.subr.bf16.mxu0 %v4458_v54 }
 0x347   :  { %3391 = vmatpush3.bf16.msra.mxu1 %v4458_v54 }
 0x348   :  { %3392 = vmatprep.subr.bf16.mxu1 %v4458_v54 }
 0x349   :  { %3377 = vmatpush3.bf16.msra.mxu0 %v4458_v54 }
 0x34a   :  { %3378 = vmatprep.subr.bf16.mxu0 %v4458_v54 }
 0x34b   :  { %3393 = vmatpush3.bf16.msra.mxu1 %v4458_v54 }
 0x34c   :  { %3394 = vmatprep.subr.bf16.mxu1 %v4458_v54 }
 0x34d   :  { %3379 = vmatpush3.bf16.msra.mxu0 %v4458_v54 }
 0x34e   :  { %3380 = vmatprep.subr.bf16.mxu0 %v4458_v54 }
 0x34f   :  { %3395 = vmatpush3.bf16.msra.mxu1 %v4458_v54 }
 0x350   :  { %3396 = vmatprep.subr.bf16.mxu1 %v4458_v54 }
 0x351   :  { %3381 = vmatpush3.bf16.msra.mxu0 %v4458_v54 }
 0x352   :  { %3398 = vmatprep.subr.bf16.mxu0 %v4458_v54 }
 0x353   :  { %3397 = vmatpush3.bf16.msra.mxu1 %v4458_v54 }
 0x354   :  { %3414 = vmatprep.subr.bf16.mxu1 %v4458_v54  ;;  %2407 = vmatmul.mubr.f32.vlgmr.msra.gmra.mrb[28].mxu0 %v4322_v37 }
 0x355   :  { %2411 = vmatprep.mubr.f32.mxu0 %v4318_v29  ;;  %3399 = vmatpush3.bf16.msra.mxu0 %v4458_v54 }
 0x356   :  { %2482 = vmatmul.mubr.f32.vlgmr.msra.gmra.mrb[28].mxu1 %v4325_v46  ;;  %3400 = vmatprep.subr.bf16.mxu0 %v4458_v54 }
 0x357   :  { %2486 = vmatprep.mubr.f32.mxu1 %v4328_v61  ;;  %3415 = vmatpush3.bf16.msra.mxu1 %v4458_v54 }
 0x358   :  { %2412 = vmatmul.mubr.f32.gmra.mrb[30].mxu0 %v4332_v24  ;;  %3416 = vmatprep.subr.bf16.mxu1 %v4458_v54 }
 0x359   :  { %2648 = vmatprep.mubr.f32.mxu0 %v4340_v7  ;;  %3401 = vmatpush3.bf16.msra.mxu0 %v4458_v54 }
 0x35a   :  { %2487 = vmatmul.mubr.f32.gmra.mrb[30].mxu1 %v4336_v23  ;;  %3402 = vmatprep.subr.bf16.mxu0 %v4458_v54 }
 0x35b   :  { %2723 = vmatprep.mubr.f32.mxu1 %v4344_v11  ;;  %3417 = vmatpush3.bf16.msra.mxu1 %v4458_v54 }
 0x35c   :  { %3418 = vmatprep.subr.bf16.mxu1 %v4458_v54 }
 0x35d   :  { %3403 = vmatpush3.bf16.msra.mxu0 %v4458_v54 }
 0x35e   :  { %3404 = vmatprep.subr.bf16.mxu0 %v4458_v54 }
 0x35f   :  { %3419 = vmatpush3.bf16.msra.mxu1 %v4458_v54 }
 0x360   :  { %3420 = vmatprep.subr.bf16.mxu1 %v4458_v54 }
 0x361   :  { %3405 = vmatpush3.bf16.msra.mxu0 %v4458_v54 }
 0x362   :  { %3406 = vmatprep.subr.bf16.mxu0 %v4458_v54 }
 0x363   :  { %3421 = vmatpush3.bf16.msra.mxu1 %v4458_v54 }
 0x364   :  { %3422 = vmatprep.subr.bf16.mxu1 %v4458_v54 }
 0x365   :  { %3407 = vmatpush3.bf16.msra.mxu0 %v4458_v54 }
 0x366   :  { %3408 = vmatprep.subr.bf16.mxu0 %v4458_v54 }
 0x367   :  { %3423 = vmatpush3.bf16.msra.mxu1 %v4458_v54 }
 0x368   :  { %3424 = vmatprep.subr.bf16.mxu1 %v4458_v54 }
 0x369   :  { %3409 = vmatpush3.bf16.msra.mxu0 %v4458_v54 }
 0x36a   :  { %3410 = vmatprep.subr.bf16.mxu0 %v4458_v54 }
 0x36b   :  { %3425 = vmatpush3.bf16.msra.mxu1 %v4458_v54 }
 0x36c   :  { %3426 = vmatprep.subr.bf16.mxu1 %v4458_v54 }
 0x36d   :  { %3411 = vmatpush3.bf16.msra.mxu0 %v4458_v54 }
 0x36e   :  { %3412 = vmatprep.subr.bf16.mxu0 %v4458_v54 }
 0x36f   :  { %3427 = vmatpush3.bf16.msra.mxu1 %v4458_v54 }
 0x370   :  { %3428 = vmatprep.subr.bf16.mxu1 %v4458_v54 }
 0x371   :  { %3413 = vmatpush3.bf16.msra.mxu0 %v4458_v54 }
 0x373   :  { %3429 = vmatpush3.bf16.msra.mxu1 %v4458_v54  ;;  %v3638_v54 = vmov 0  }
 0x374   :  { %2649 = vmatmul.mubr.f32.vlgmr.msra.gmra.mrb[32].mxu0 %v4385_v48  ;;  %3466 = vset.pattern.permute.xlu0 %v3638_v54 }
 0x375   :  { %2653 = vmatprep.mubr.f32.mxu0 %v4382_v19  ;;  %3467 = vset.pattern.permute.xlu1 %v3638_v54 }
 0x376   :  { %2724 = vmatmul.mubr.f32.vlgmr.msra.gmra.mrb[32].mxu1 %v4387_v26 }
 0x377   :  { %2728 = vmatprep.mubr.f32.mxu1 %v4390_v36 }
 0x378   :  { %2654 = vmatmul.mubr.f32.gmra.mrb[34].mxu0 %v4395_v4 }
 0x37a   :  { %2729 = vmatmul.mubr.f32.gmra.mrb[34].mxu1 %v4397_v22 }
 0x3e7   :  { %v2838_v0 = vpop.f32.mrb[20].mxu0 }
 0x3e8   :  { %v2839_v35 = vpop.f32.mrb[21].mxu0 }
 0x3e9   :  { %v2876_v30 = vpop.f32.mrb[20].mxu1  ;;  %v2840_v57 = vadd.f32 %v2839_v35, %v2838_v0 }
 0x3ea   :  { %v2877_v33 = vpop.f32.mrb[21].mxu1 }
 0x3eb   :  { %v2878_v6 = vadd.f32 %v2877_v33, %v2876_v30 }
 0x3ed   :  { %v2000_v62 = vadd.f32 %v2878_v6, %v2840_v57  ;;  %v2841_v25 = vpop.f32.mrb[22].mxu0 }
 0x3ee   :  { %v2842_v17 = vpop.f32.mrb[23].mxu0 }
 0x3ef   :  { %3540 = vrcp.f32 %v2000_v62  ;;  %v2843_v43 = vadd.f32 %v2842_v17, %v2841_v25 }
 0x3f0   :  { %v2879_v56 = vpop.f32.mrb[22].mxu1 }
 0x3f1   :  { %v2880_v41 = vpop.f32.mrb[23].mxu1 }
 0x3f2   :  { %v2881_v38 = vadd.f32 %v2880_v41, %v2879_v56 }
 0x3f4   :  { %v2005_v27 = vadd.f32 %v2881_v38, %v2843_v43 }
 0x3f6   :  { %3542 = vrcp.f32 %v2005_v27 }
 0x3f9   :  { %v3541_v59 = vpop.eup %3540 }
 0x3fa   :  { %v2010_v40 = vmul.f32 %v3541_v59, %v2000_v62 }
 0x3fc   :  { %v2012_v50 = vsub.f32 2.0, %v2010_v40 }
 0x3fe   :  { %v2014_v53 = vmul.f32 %v3541_v59, %v2012_v50 }
 0x400   :  { %2018 = vperm.xlu0 %3466, %v2014_v53   ;;  %v3543_v10 = vpop.eup %3542 }
 0x401   :  { %v2011_v15 = vmul.f32 %v3543_v10, %v2005_v27 }
 0x403   :  { %v2013_v52 = vsub.f32 2.0, %v2011_v15 }
 0x405   :  { %v2015_v31 = vmul.f32 %v3543_v10, %v2013_v52 }
 0x407   :  { %2023 = vperm.xlu1 %3467, %v2015_v31   ;;  %v2914_v55 = vpop.f32.mrb[24].mxu0 }
 0x408   :  { %v2915_v32 = vpop.f32.mrb[25].mxu0 }
 0x409   :  { %v2952_v63 = vpop.f32.mrb[24].mxu1  ;;  %v2916_v45 = vadd.f32 %v2915_v32, %v2914_v55 }
 0x40a   :  { %v2953_v47 = vpop.f32.mrb[25].mxu1 }
 0x40b   :  { %v2954_v16 = vadd.f32 %v2953_v47, %v2952_v63  ;;  %v2917_v21 = vpop.f32.mrb[26].mxu0 }
 0x40c   :  { %v2918_v54 = vpop.f32.mrb[27].mxu0 }
 0x40d   :  { %v2242_v14 = vadd.f32 %v2954_v16, %v2916_v45  ;;  %v2955_v2 = vpop.f32.mrb[26].mxu1  ;;  %v2919_v0 = vadd.f32 %v2918_v54, %v2917_v21 }
 0x40e   :  { %v2956_v35 = vpop.f32.mrb[27].mxu1 }
 0x40f   :  { %3544 = vrcp.f32 %v2242_v14  ;;  %v2957_v30 = vadd.f32 %v2956_v35, %v2955_v2 }
 0x411   :  { %v2247_v57 = vadd.f32 %v2957_v30, %v2919_v0 }
 0x413   :  { %3546 = vrcp.f32 %v2247_v57 }
 0x419   :  { %v3545_v33 = vpop.eup %3544 }
 0x41a   :  { %v2252_v6 = vmul.f32 %v3545_v33, %v2242_v14 }
 0x41c   :  { %v2254_v62 = vsub.f32 2.0, %v2252_v6 }
 0x41d   :  { %v3547_v25 = vpop.eup %3546 }
 0x41e   :  { %v2253_v17 = vmul.f32 %v3547_v25, %v2247_v57  ;;  %v2256_v56 = vmul.f32 %v3545_v33, %v2254_v62 }
 0x420   :  { %v2255_v43 = vsub.f32 2.0, %v2253_v17  ;;  %2260 = vperm.xlu1 %3467, %v2256_v56  }
 0x422   :  { %v2257_v41 = vmul.f32 %v3547_v25, %v2255_v43 }
 0x424   :  { %2265 = vperm.xlu1 %3467, %v2257_v41  }
 0x427   :  { %v2990_v38 = vpop.f32.mrb[28].mxu0 }
 0x428   :  { %v2991_v59 = vpop.f32.mrb[29].mxu0 }
 0x429   :  { %v3028_v27 = vpop.f32.mrb[28].mxu1  ;;  %v2992_v40 = vadd.f32 %v2991_v59, %v2990_v38 }
 0x42a   :  { %v3029_v50 = vpop.f32.mrb[29].mxu1 }
 0x42b   :  { %v3030_v53 = vadd.f32 %v3029_v50, %v3028_v27  ;;  %v2993_v10 = vpop.f32.mrb[30].mxu0 }
 0x42c   :  { %v2994_v31 = vpop.f32.mrb[31].mxu0 }
 0x42d   :  { %v2484_v15 = vadd.f32 %v3030_v53, %v2992_v40  ;;  %v3031_v52 = vpop.f32.mrb[30].mxu1  ;;  %v2995_v55 = vadd.f32 %v2994_v31, %v2993_v10 }
 0x42e   :  { %v3032_v63 = vpop.f32.mrb[31].mxu1 }
 0x42f   :  { %3548 = vrcp.f32 %v2484_v15  ;;  %v3033_v32 = vadd.f32 %v3032_v63, %v3031_v52 }
 0x431   :  { %v2489_v45 = vadd.f32 %v3033_v32, %v2995_v55 }
 0x433   :  { %3550 = vrcp.f32 %v2489_v45 }
 0x439   :  { %v3549_v47 = vpop.eup %3548 }
 0x43a   :  { %v2494_v16 = vmul.f32 %v3549_v47, %v2484_v15 }
 0x43c   :  { %v2496_v21 = vsub.f32 2.0, %v2494_v16 }
 0x43d   :  { %v3551_v14 = vpop.eup %3550 }
 0x43e   :  { %v2495_v2 = vmul.f32 %v3551_v14, %v2489_v45  ;;  %v2498_v54 = vmul.f32 %v3549_v47, %v2496_v21 }
 0x440   :  { %v2497_v0 = vsub.f32 2.0, %v2495_v2  ;;  %2502 = vperm.xlu1 %3467, %v2498_v54  }
 0x442   :  { %v2499_v35 = vmul.f32 %v3551_v14, %v2497_v0 }
 0x444   :  { %2507 = vperm.xlu1 %3467, %v2499_v35  }
 0x447   :  { %v3066_v30 = vpop.f32.mrb[32].mxu0 }
 0x448   :  { %v3067_v33 = vpop.f32.mrb[33].mxu0 }
 0x449   :  { %v3104_v57 = vpop.f32.mrb[32].mxu1  ;;  %v3068_v6 = vadd.f32 %v3067_v33, %v3066_v30 }
 0x44a   :  { %v3105_v62 = vpop.f32.mrb[33].mxu1 }
 0x44b   :  { %v3106_v25 = vadd.f32 %v3105_v62, %v3104_v57  ;;  %v3069_v17 = vpop.f32.mrb[34].mxu0 }
 0x44c   :  { %v3070_v41 = vpop.f32.mrb[35].mxu0 }
 0x44d   :  { %v2726_v56 = vadd.f32 %v3106_v25, %v3068_v6  ;;  %v3107_v43 = vpop.f32.mrb[34].mxu1  ;;  %v3071_v38 = vadd.f32 %v3070_v41, %v3069_v17 }
 0x44e   :  { %v3108_v27 = vpop.f32.mrb[35].mxu1 }
 0x44f   :  { %3552 = vrcp.f32 %v2726_v56  ;;  %v3109_v59 = vadd.f32 %v3108_v27, %v3107_v43 }
 0x451   :  { %v2731_v40 = vadd.f32 %v3109_v59, %v3071_v38 }
 0x453   :  { %3554 = vrcp.f32 %v2731_v40 }
 0x459   :  { %v3553_v50 = vpop.eup %3552 }
 0x45a   :  { %v2736_v53 = vmul.f32 %v3553_v50, %v2726_v56 }
 0x45c   :  { %v2738_v10 = vsub.f32 2.0, %v2736_v53 }
 0x45d   :  { %v3555_v15 = vpop.eup %3554 }
 0x45e   :  { %v2737_v52 = vmul.f32 %v3555_v15, %v2731_v40  ;;  %v2740_v31 = vmul.f32 %v3553_v50, %v2738_v10 }
 0x460   :  { %v2739_v55 = vsub.f32 2.0, %v2737_v52  ;;  %2744 = vperm.xlu1 %3467, %v2740_v31  }
 0x462   :  { %v2741_v63 = vmul.f32 %v3555_v15, %v2739_v55 }
 0x464   :  { %2749 = vperm.xlu1 %3467, %v2741_v63  }
 0x47f   :  { %v2019_v32 = vpop.permute.xlu0 %2018 }
 0x480   :  { %v2026_v45 = vmul.f32 %v4175_v1, %v2019_v32  ;;  %v2027_v47 = vmul.f32 %v4177_v28, %v2019_v32  ;;  %v2028_v16 = vmul.f32 %v4179_v51, %v2019_v32  ;;  %v2029_v21 = vmul.f32 %v4182_v58, %v2019_v32 }
 0x482   :  { %2034 = vst [vmem:[#allocation8] sm:$0xff] %v2026_v45  ;;  %2035 = vst [vmem:[#allocation8 + $0x8] sm:$0xff] %v2027_v47 }
 0x483   :  { %2036 = vst [vmem:[#allocation8 + $0x10] sm:$0xff] %v2028_v16  ;;  %2037 = vst [vmem:[#allocation8 + $0x18] sm:$0xff] %v2029_v21 }
 0x486   :  { %v2024_v14 = vpop.permute.xlu1 %2023 }
 0x487   :  { %v2030_v2 = vmul.f32 %v4193_v12, %v2024_v14  ;;  %v2031_v54 = vmul.f32 %v4196_v13, %v2024_v14  ;;  %v2032_v0 = vmul.f32 %v4199_v42, %v2024_v14  ;;  %v2033_v35 = vmul.f32 %v4203_v44, %v2024_v14 }
 0x489   :  { %2038 = vst [vmem:[#allocation8 + $0x20] sm:$0xff] %v2030_v2  ;;  %2039 = vst [vmem:[#allocation8 + $0x28] sm:$0xff] %v2031_v54 }
 0x48a   :  { %2040 = vst [vmem:[#allocation8 + $0x30] sm:$0xff] %v2032_v0  ;;  %2041 = vst [vmem:[#allocation8 + $0x38] sm:$0xff] %v2033_v35 }
 0x49f   :  { %v2261_v1 = vpop.permute.xlu1 %2260 }
 0x4a0   :  { %v2268_v28 = vmul.f32 %v4248_v18, %v2261_v1  ;;  %v2269_v51 = vmul.f32 %v4190_v9, %v2261_v1  ;;  %v2270_v58 = vmul.f32 %v4252_v3, %v2261_v1  ;;  %v2271_v30 = vmul.f32 %v4209_v20, %v2261_v1 }
 0x4a2   :  { %2276 = vst [vmem:[#allocation8 + $0x40] sm:$0xff] %v2268_v28  ;;  %2277 = vst [vmem:[#allocation8 + $0x48] sm:$0xff] %v2269_v51 }
 0x4a3   :  { %2278 = vst [vmem:[#allocation8 + $0x50] sm:$0xff] %v2270_v58  ;;  %2279 = vst [vmem:[#allocation8 + $0x58] sm:$0xff] %v2271_v30  ;;  %v2266_v12 = vpop.permute.xlu1 %2265 }
 0x4a4   :  { %v2272_v13 = vmul.f32 %v4262_v5, %v2266_v12  ;;  %v2273_v42 = vmul.f32 %v4255_v60, %v2266_v12  ;;  %v2274_v44 = vmul.f32 %v4266_v34, %v2266_v12  ;;  %v2275_v57 = vmul.f32 %v4258_v8, %v2266_v12 }
 0x4a6   :  { %2280 = vst [vmem:[#allocation8 + $0x60] sm:$0xff] %v2272_v13  ;;  %2281 = vst [vmem:[#allocation8 + $0x68] sm:$0xff] %v2273_v42 }
 0x4a7   :  { %2282 = vst [vmem:[#allocation8 + $0x70] sm:$0xff] %v2274_v44  ;;  %2283 = vst [vmem:[#allocation8 + $0x78] sm:$0xff] %v2275_v57 }
 0x4bf   :  { %v2503_v9 = vpop.permute.xlu1 %2502 }
 0x4c0   :  { %v2510_v20 = vmul.f32 %v4322_v37, %v2503_v9  ;;  %v2511_v18 = vmul.f32 %v4270_v39, %v2503_v9  ;;  %v2512_v3 = vmul.f32 %v4325_v46, %v2503_v9  ;;  %v2513_v33 = vmul.f32 %v4274_v49, %v2503_v9 }
 0x4c2   :  { %2518 = vst [vmem:[#allocation8 + $0x80] sm:$0xff] %v2510_v20  ;;  %2519 = vst [vmem:[#allocation8 + $0x88] sm:$0xff] %v2511_v18 }
 0x4c3   :  { %2520 = vst [vmem:[#allocation8 + $0x90] sm:$0xff] %v2512_v3  ;;  %2521 = vst [vmem:[#allocation8 + $0x98] sm:$0xff] %v2513_v33  ;;  %v2508_v60 = vpop.permute.xlu1 %2507 }
 0x4c4   :  { %v2514_v8 = vmul.f32 %v4332_v24, %v2508_v60  ;;  %v2515_v5 = vmul.f32 %v4318_v29, %v2508_v60  ;;  %v2516_v34 = vmul.f32 %v4336_v23, %v2508_v60  ;;  %v2517_v6 = vmul.f32 %v4328_v61, %v2508_v60 }
 0x4c6   :  { %2522 = vst [vmem:[#allocation8 + $0xa0] sm:$0xff] %v2514_v8  ;;  %2523 = vst [vmem:[#allocation8 + $0xa8] sm:$0xff] %v2515_v5 }
 0x4c7   :  { %2524 = vst [vmem:[#allocation8 + $0xb0] sm:$0xff] %v2516_v34  ;;  %2525 = vst [vmem:[#allocation8 + $0xb8] sm:$0xff] %v2517_v6 }
 0x4df   :  { %v2745_v39 = vpop.permute.xlu1 %2744 }
 0x4e0   :  { %v2752_v49 = vmul.f32 %v4385_v48, %v2745_v39  ;;  %v2753_v37 = vmul.f32 %v4340_v7, %v2745_v39  ;;  %v2754_v46 = vmul.f32 %v4387_v26, %v2745_v39  ;;  %v2755_v62 = vmul.f32 %v4344_v11, %v2745_v39 }
 0x4e2   :  { %2760 = vst [vmem:[#allocation8 + $0xc0] sm:$0xff] %v2752_v49  ;;  %2761 = vst [vmem:[#allocation8 + $0xc8] sm:$0xff] %v2753_v37 }
 0x4e3   :  { %2762 = vst [vmem:[#allocation8 + $0xd0] sm:$0xff] %v2754_v46  ;;  %2763 = vst [vmem:[#allocation8 + $0xd8] sm:$0xff] %v2755_v62  ;;  %v2750_v29 = vpop.permute.xlu1 %2749 }
 0x4e4   :  { %v2756_v61 = vmul.f32 %v4395_v4, %v2750_v29  ;;  %v2757_v24 = vmul.f32 %v4382_v19, %v2750_v29  ;;  %v2758_v23 = vmul.f32 %v4397_v22, %v2750_v29  ;;  %v2759_v48 = vmul.f32 %v4390_v36, %v2750_v29 }
 0x4e6   :  { %2764 = vst [vmem:[#allocation8 + $0xe0] sm:$0xff] %v2756_v61  ;;  %2765 = vst [vmem:[#allocation8 + $0xe8] sm:$0xff] %v2757_v24 }
 0x4e7   :  { %2766 = vst [vmem:[#allocation8 + $0xf0] sm:$0xff] %v2758_v23  ;;  %2767 = vst [vmem:[#allocation8 + $0xf8] sm:$0xff] %v2759_v48 }
 0x4e8   :  { %3611 = shalt.err (!%p3608_p6)
}
 0x4e9   :  { %s3612_s24 = scalar_lea.hbm %s4452_s4, 4096 }
 0x4ea   :  { %p3613_p7 = scmp.ne.s32.totalorder %s4452_s4, %s3612_s24  ;;  %p3616_p8 = scmp.lt.u32.totalorder %s3612_s24, %s4452_s4 }
 0x4ec   :  { %p3618_p9 = pnand %p3616_p8, %p3613_p7 }
 0x4ee   :  { %3621 = shalt.err (!%p3618_p9)
}
 0x4ef   :  { %2779 = dma.vmem_to_hbm [thread:$0]  %s2774_s20, 4096, %s4452_s4, [#allocation5], %s3632_s0, %s3632_s0, %s3633_s13  }
 0x4f0   :  { %3626 = dma.done.wait [#allocation5], 4096  }
 0x4f1   :  { %3627 = vsyncadd [#allocation5], 4294963200 }
 0x4f2   :  { %2783 = vsyncpa [#allocation4], 1 }
 0x4f3   :  { %2784 = vsyncpa [#allocation7], 1 }
 0x4f4   :  { %2785 = vsyncpa [#allocation5], 1 }

</bundles_post_ra>
